<compile_context>
chip_gen: v7x
topology: tpu7x:2x2x1
jax: 0.10.0
libtpu: 0.0.40
codegen_flags: <defaults>
</compile_context>

<pallas_src>
import jax
import jax.numpy as jnp
from jax.experimental import pallas as pl
from jax.experimental.pallas import tpu as pltpu

B = 2
S = 16                       # power of two (batch separation uses `row & (S-1)`)
HIDDEN = 64
HEADS = 4
HEAD_DIM = HIDDEN // HEADS
INTER = 128
KERNEL_SIZE = 3
EPS = 1e-5
BS = B * S                   # batch folded into the matmul M dimension
NEG_INF = -1e9               # cross-(head,batch) block mask value

# MXU operand dtype. float32 keeps tight parity with the f32 reference; on v6e/v7x
# set jnp.bfloat16 for ~2x MXU throughput and half the weight DMA bytes.
MXU_DTYPE = jnp.float32

# ---------------- slab A: all matrices with input dim HIDDEN (column blocks 128-aligned)
A_FFI_GU = 0        # (H, 2*INTER)   ff_in  gate|up
A_QKV    = 256      # (H, 3*H)       q|k|v  (q pre-scaled by HEAD_DIM**-0.5)
A_O      = 512      # (H, H)         attention out-proj
A_CV_GLU = 640      # (H, 2*H)       conv GLU proj1|proj2
A_CV_PW  = 768      # (H, H)         conv pointwise
A_CV_EXT = 896      # (H, H)         conv ext pointwise
A_FFO_GU = 1024     # (H, 2*INTER)   ff_out gate|up
A_WIDTH  = 1280

# ---------------- slab B: matrices with input dim INTER
B_FFI_DN = 0        # (INTER, H) ff_in  down-proj
B_FFO_DN = 128      # (INTER, H) ff_out down-proj
B_WIDTH  = 256

# ---------------- vector slab rows (each row padded to VEC_W lanes)
VEC_W = 256
(V_FFI_LNW, V_FFI_LNB, V_FFI_GUB, V_FFI_DNB,
 V_ATT_LNW, V_ATT_LNB, V_QKV_B, V_O_B,
 V_CV_LNW, V_CV_LNB, V_CV_GLUB, V_CV_DWB, V_CV_PWB, V_CV_EXTB,
 V_FFO_LNW, V_FFO_LNB, V_FFO_GUB, V_FFO_DNB,
 V_FN_LNW, V_FN_LNB, V_DW_TAP0) = range(21)
VEC_ROWS = V_DW_TAP0 + KERNEL_SIZE          # 23 real rows
VEC_ROWS_PAD = 24                           # padded to a sublane multiple


# ---------------------------------------------------------------- fused layer kernel
# TODO(synk): nn.Dropout inside the ConvModule is an inference no-op and is skipped.
def conformer_layer_kernel(x_ref, mask_ref, wa_ref, wb_ref, vec_ref, o_ref):
    def vec(row, n):
        return vec_ref[row:row + 1, :n]                       # (1, n) broadcast row

    def ln(h, wrow, brow):
        mu = jnp.mean(h, axis=-1, keepdims=True)
        var = jnp.mean(jnp.square(h - mu), axis=-1, keepdims=True)
        return (h - mu) * jax.lax.rsqrt(var + EPS) * vec(wrow, HIDDEN) + vec(brow, HIDDEN)

    def mm(a, w):
        return jnp.dot(a.astype(MXU_DTYPE), w.astype(MXU_DTYPE),
                       preferred_element_type=jnp.float32)

    def sigmoid(z):
        return 1.0 / (1.0 + jnp.exp(-z))                      # exp lands on the EUP

    def mlp(h, lnw, lnb, gu_off, gub, dn_off, dnb):
        n = ln(h, lnw, lnb)
        gu = mm(n, wa_ref[:, gu_off:gu_off + 2 * INTER]) + vec(gub, 2 * INTER)
        gate, up = gu[:, :INTER], gu[:, INTER:]               # 128-aligned slices
        act = gate * (up * sigmoid(up))                       # MulAndSilu
        return mm(act, wb_ref[:, dn_off:dn_off + HIDDEN]) + vec(dnb, HIDDEN)

    x = x_ref[...]                                            # (BS, H)

    # ---- feed_forward_in (half residual)
    h = x + 0.5 * mlp(x, V_FFI_LNW, V_FFI_LNB, A_FFI_GU, V_FFI_GUB, B_FFI_DN, V_FFI_DNB)

    # ---- self-attention: stacked block-diagonal formulation over (head, batch)
    n = ln(h, V_ATT_LNW, V_ATT_LNB)
    qkv = mm(n, wa_ref[:, A_QKV:A_QKV + 3 * HIDDEN]) + vec(V_QKV_B, 3 * HIDDEN)  # (BS, 3H)
    q_st = jnp.concatenate(
        [qkv[:, i * HEAD_DIM:(i + 1) * HEAD_DIM] for i in range(HEADS)], axis=0)
    k_st = jnp.concatenate(
        [qkv[:, HIDDEN + i * HEAD_DIM:HIDDEN + (i + 1) * HEAD_DIM]
         for i in range(HEADS)], axis=0)
    v_st = jnp.concatenate(
        [qkv[:, 2 * HIDDEN + i * HEAD_DIM:2 * HIDDEN + (i + 1) * HEAD_DIM]
         for i in range(HEADS)], axis=0)                       # each (HEADS*BS, Dh)
    s = jax.lax.dot_general(q_st.astype(MXU_DTYPE), k_st.astype(MXU_DTYPE),
                            (((1,), (1,)), ((), ())),
                            preferred_element_type=jnp.float32)        # (128, 128)
    s = s + mask_ref[...]                 # block-diag mask; q scale folded into W_q
    e = jnp.exp(s - jnp.max(s, axis=-1, keepdims=True))
    prob = e * pl.reciprocal(jnp.sum(e, axis=-1, keepdims=True), approx=True)
    ctx = mm(prob, v_st)                                               # (128, Dh)
    # O-projection per head-block with accumulation (no lane concat of heads)
    attn = mm(ctx[0:BS, :], wa_ref[0:HEAD_DIM, A_O:A_O + HIDDEN])
    for i in range(1, HEADS):
        attn = attn + mm(ctx[i * BS:(i + 1) * BS, :],
                         wa_ref[i * HEAD_DIM:(i + 1) * HEAD_DIM, A_O:A_O + HIDDEN])
    h = h + attn + vec(V_O_B, HIDDEN)

    # ---- conv module: h = h + ext_pw(relu(pw(dw_causal(GLU(LN(h))))))
    n = ln(h, V_CV_LNW, V_CV_LNB)
    glu = mm(n, wa_ref[:, A_CV_GLU:A_CV_GLU + 2 * HIDDEN]) + vec(V_CV_GLUB, 2 * HIDDEN)
    u = glu[:, :HIDDEN] * sigmoid(glu[:, HIDDEN:])             # conv_glu_type = sigmoid
    # causal depthwise conv over seq; (row & (S-1)) keeps folded batches separate
    row = jax.lax.broadcasted_iota(jnp.int32, (BS, HIDDEN), 0) & (S - 1)
    acc = u * vec(V_DW_TAP0 + KERNEL_SIZE - 1, HIDDEN)          # zero-shift tap
    for shift in range(1, KERNEL_SIZE):
        tap = KERNEL_SIZE - 1 - shift
        shifted = jnp.where(row >= shift, pltpu.roll(u, shift, axis=0), 0.0)
        acc = acc + shifted * vec(V_DW_TAP0 + tap, HIDDEN)
    acc = acc + vec(V_CV_DWB, HIDDEN)
    pw = jnp.maximum(mm(acc, wa_ref[:, A_CV_PW:A_CV_PW + HIDDEN])
                     + vec(V_CV_PWB, HIDDEN), 0.0)              # activation = relu
    h = h + mm(pw, wa_ref[:, A_CV_EXT:A_CV_EXT + HIDDEN]) + vec(V_CV_EXTB, HIDDEN)

    # ---- feed_forward_out (half residual) + final LayerNorm
    h = h + 0.5 * mlp(h, V_FFO_LNW, V_FFO_LNB, A_FFO_GU, V_FFO_GUB, B_FFO_DN, V_FFO_DNB)
    o_ref[...] = ln(h, V_FN_LNW, V_FN_LNB)


# ---------------------------------------------------------------- wrapper glue
def conformer_layer(x, mask, p):
    f32 = jnp.float32
    scale = HEAD_DIM ** -0.5

    def pad_cols(w, total):
        return jnp.pad(w, ((0, 0), (0, total - w.shape[1])))

    # --- slab A (HIDDEN-input matrices, 128-aligned column blocks)
    qkv_w = jnp.concatenate([p["attn.q_w"] * scale, p["attn.k_w"], p["attn.v_w"]], axis=1)
    slab_a = jnp.concatenate([
        jnp.concatenate([p["ff_in.gate_w"], p["ff_in.up_w"]], axis=1),      # 256
        pad_cols(qkv_w, 256),                                               # 256
        pad_cols(p["attn.o_w"], 128),                                       # 128
        jnp.concatenate([p["conv.glu1_w"], p["conv.glu2_w"]], axis=1),      # 128
        pad_cols(p["conv.pw_w"], 128),                                      # 128
        pad_cols(p["conv.ext_w"], 128),                                     # 128
        jnp.concatenate([p["ff_out.gate_w"], p["ff_out.up_w"]], axis=1),    # 256
    ], axis=1).astype(MXU_DTYPE)                                            # (64, 1280)

    # --- slab B (INTER-input matrices)
    slab_b = jnp.concatenate([pad_cols(p["ff_in.down_w"], 128),
                              pad_cols(p["ff_out.down_w"], 128)],
                             axis=1).astype(MXU_DTYPE)                      # (128, 256)

    # --- vector slab: every LN weight / bias vector as one padded row
    def vrow(v):
        return jnp.pad(v, (0, VEC_W - v.shape[0]))[None, :]

    cat = jnp.concatenate
    vec_rows = [
        vrow(p["ff_in.ln_w"]), vrow(p["ff_in.ln_b"]),
        vrow(cat([p["ff_in.gate_b"], p["ff_in.up_b"]])), vrow(p["ff_in.down_b"]),
        vrow(p["ln_att.w"]), vrow(p["ln_att.b"]),
        vrow(cat([p["attn.q_b"] * scale, p["attn.k_b"], p["attn.v_b"]])),
        vrow(p["attn.o_b"]),
        vrow(p["conv.ln_w"]), vrow(p["conv.ln_b"]),
        vrow(cat([p["conv.glu1_b"] + p["conv.b1"], p["conv.glu2_b"] + p["conv.b2"]])),
        vrow(p["conv.dw_b"]), vrow(p["conv.pw_b"]), vrow(p["conv.ext_b"]),
        vrow(p["ff_out.ln_w"]), vrow(p["ff_out.ln_b"]),
        vrow(cat([p["ff_out.gate_b"], p["ff_out.up_b"]])), vrow(p["ff_out.down_b"]),
        vrow(p["ln_final.w"]), vrow(p["ln_final.b"]),
    ] + [vrow(p["conv.dw_w"][j]) for j in range(KERNEL_SIZE)]
    vecs = cat(vec_rows, axis=0)
    vecs = jnp.pad(vecs, ((0, VEC_ROWS_PAD - vecs.shape[0]), (0, 0)))       # (24, 256)

    # --- stacked block-diagonal attention mask, rows/cols ordered (head, batch, seq)
    m_t = mask.transpose(1, 0, 2, 3).reshape(HEADS * B, S, S)
    big = jnp.full((HEADS * B, S, HEADS * B, S), NEG_INF, f32)
    idx = jnp.arange(HEADS * B)
    big = big.at[idx, :, idx, :].set(m_t)
    mask_st = big.reshape(HEADS * B * S, HEADS * B * S)                     # (128, 128)

    vmem = pl.BlockSpec(memory_space=pltpu.MemorySpace.VMEM)
    out2 = pl.pallas_call(
        conformer_layer_kernel,
        out_shape=jax.ShapeDtypeStruct((BS, HIDDEN), f32),
        in_specs=[vmem] * 5,
        out_specs=vmem,
    )(x.reshape(BS, HIDDEN), mask_st, slab_a, slab_b, vecs)
    return out2.reshape(B, S, HIDDEN)


# ---------------------------------------------------------------- deterministic params
def init_params(key):
    ks = iter(jax.random.split(key, 64))

    def w(shape, scale=0.08):
        return jax.random.normal(next(ks), shape, jnp.float32) * scale

    def ln_w():
        return 1.0 + w((HIDDEN,), 0.02)

    p = {}
    for name in ("ff_in", "ff_out"):
        p[f"{name}.ln_w"], p[f"{name}.ln_b"] = ln_w(), w((HIDDEN,), 0.02)
        p[f"{name}.gate_w"], p[f"{name}.gate_b"] = w((HIDDEN, INTER)), w((INTER,), 0.02)
        p[f"{name}.up_w"], p[f"{name}.up_b"] = w((HIDDEN, INTER)), w((INTER,), 0.02)
        p[f"{name}.down_w"], p[f"{name}.down_b"] = w((INTER, HIDDEN)), w((HIDDEN,), 0.02)
    p["ln_att.w"], p["ln_att.b"] = ln_w(), w((HIDDEN,), 0.02)
    for n in ("q", "k", "v", "o"):
        p[f"attn.{n}_w"], p[f"attn.{n}_b"] = w((HIDDEN, HIDDEN)), w((HIDDEN,), 0.02)
    p["conv.ln_w"], p["conv.ln_b"] = ln_w(), w((HIDDEN,), 0.02)
    p["conv.glu1_w"], p["conv.glu1_b"] = w((HIDDEN, HIDDEN)), w((HIDDEN,), 0.02)
    p["conv.glu2_w"], p["conv.glu2_b"] = w((HIDDEN, HIDDEN)), w((HIDDEN,), 0.02)
    p["conv.b1"], p["conv.b2"] = w((HIDDEN,), 0.02), w((HIDDEN,), 0.02)
    p["conv.dw_w"], p["conv.dw_b"] = w((KERNEL_SIZE, HIDDEN)), w((HIDDEN,), 0.02)
    p["conv.pw_w"], p["conv.pw_b"] = w((HIDDEN, HIDDEN)), w((HIDDEN,), 0.02)
    p["conv.ext_w"], p["conv.ext_b"] = w((HIDDEN, HIDDEN)), w((HIDDEN,), 0.02)
    p["ln_final.w"], p["ln_final.b"] = ln_w(), w((HIDDEN,), 0.02)
    return p


# ---------------------------------------------------------------- pure-JAX reference
def ref_forward(x, mask, p):
    def sigmoid(z):
        return 1.0 / (1.0 + jnp.exp(-z))

    def ln(h, w, b):
        mu = h.mean(-1, keepdims=True)
        var = ((h - mu) ** 2).mean(-1, keepdims=True)
        return (h - mu) / jnp.sqrt(var + EPS) * w + b

    def mlp(h, pre):
        h = ln(h, p[f"{pre}.ln_w"], p[f"{pre}.ln_b"])
        gate = h @ p[f"{pre}.gate_w"] + p[f"{pre}.gate_b"]
        up = h @ p[f"{pre}.up_w"] + p[f"{pre}.up_b"]
        act = gate * (up * sigmoid(up))
        return act @ p[f"{pre}.down_w"] + p[f"{pre}.down_b"]

    def attn(h):
        h = ln(h, p["ln_att.w"], p["ln_att.b"])

        def heads(wm, bv):
            y = h @ wm + bv
            return y.reshape(B, S, HEADS, HEAD_DIM).transpose(0, 2, 1, 3)

        q = heads(p["attn.q_w"], p["attn.q_b"])
        k = heads(p["attn.k_w"], p["attn.k_b"])
        v = heads(p["attn.v_w"], p["attn.v_b"])
        s = jnp.einsum("bhqd,bhkd->bhqk", q, k) * (HEAD_DIM ** -0.5) + mask
        pr = jax.nn.softmax(s, axis=-1)
        o = jnp.einsum("bhqk,bhkd->bhqd", pr, v).transpose(0, 2, 1, 3).reshape(B, S, HIDDEN)
        return o @ p["attn.o_w"] + p["attn.o_b"]

    def conv(h):
        h = ln(h, p["conv.ln_w"], p["conv.ln_b"])
        g1 = h @ p["conv.glu1_w"] + p["conv.glu1_b"] + p["conv.b1"]
        g2 = h @ p["conv.glu2_w"] + p["conv.glu2_b"] + p["conv.b2"]
        u = g1 * sigmoid(g2)
        upad = jnp.pad(u, ((0, 0), (KERNEL_SIZE - 1, 0), (0, 0)))
        dw = sum(p["conv.dw_w"][j] * upad[:, j:j + S, :] for j in range(KERNEL_SIZE))
        dw = dw + p["conv.dw_b"]
        pw = jnp.maximum(dw @ p["conv.pw_w"] + p["conv.pw_b"], 0.0)
        return pw @ p["conv.ext_w"] + p["conv.ext_b"]

    residual = x + 0.5 * mlp(x, "ff_in")
    h = residual + attn(residual)
    h = h + conv(h)
    h = h + 0.5 * mlp(h, "ff_out")
    return ln(h, p["ln_final.w"], p["ln_final.b"])


# ---------------------------------------------------------------- main
if __name__ == "__main__":
    key = jax.random.PRNGKey(0)
    kx, km, kp = jax.random.split(key, 3)
    x = jax.random.normal(kx, (B, S, HIDDEN), jnp.float32)
    # additive float attention mask (relative-bias-like + padding of last 3 keys of batch 1)
    mask = jax.random.normal(km, (B, HEADS, S, S), jnp.float32) * 0.1
    pad = jnp.zeros((B, 1, 1, S), jnp.float32).at[1, :, :, S - 3:].set(-1e4)
    mask = mask + pad

    params = init_params(kp)

    out = conformer_layer(x, mask, params)
    out = jax.block_until_ready(out)

    ref = ref_forward(x, mask, params)
    err = float(jnp.max(jnp.abs(out - ref)))
    tol = 2e-3 if MXU_DTYPE == jnp.float32 else 3e-2
    assert out.shape == (B, S, HIDDEN)
    assert err < tol, f"mismatch vs reference: {err}"
    print("KERNEL_OK")
</pallas_src>

<mosaic_0001>
module attributes {stable_mosaic.version = 11 : i64} {
  func.func @conformer_layer_kernel(%arg0: memref<32x64xf32, #tpu.memory_space<vmem>>, %arg1: memref<128x128xf32, #tpu.memory_space<vmem>>, %arg2: memref<64x1280xf32, #tpu.memory_space<vmem>>, %arg3: memref<128x256xf32, #tpu.memory_space<vmem>>, %arg4: memref<24x256xf32, #tpu.memory_space<vmem>>, %arg5: memref<32x64xf32, #tpu.memory_space<vmem>>) attributes {dimension_semantics = [], scalar_prefetch = 0 : i64, scratch_operands = 0 : i64, tpu.core_type = #tpu.core_type<tc>} {
    %c0 = arith.constant 0 : index
    %c0_0 = arith.constant 0 : index
    %0 = vector.load %arg0[%c0, %c0_0] : memref<32x64xf32, #tpu.memory_space<vmem>>, vector<32x64xf32>
    %cst = arith.constant dense<0.000000e+00> : vector<32xf32>
    %1 = vector.multi_reduction <add>, %0, %cst [1] : vector<32x64xf32> to vector<32xf32>
    %2 = vector.shape_cast %1 : vector<32xf32> to vector<32x1xf32>
    %cst_1 = arith.constant 6.400000e+01 : f32
    %3 = vector.broadcast %cst_1 : f32 to vector<32x1xf32>
    %4 = arith.divf %2, %3 : vector<32x1xf32>
    %5 = vector.broadcast %4 : vector<32x1xf32> to vector<32x64xf32>
    %6 = arith.subf %0, %5 : vector<32x64xf32>
    %7 = arith.mulf %6, %6 : vector<32x64xf32>
    %cst_2 = arith.constant dense<0.000000e+00> : vector<32xf32>
    %8 = vector.multi_reduction <add>, %7, %cst_2 [1] : vector<32x64xf32> to vector<32xf32>
    %9 = vector.shape_cast %8 : vector<32xf32> to vector<32x1xf32>
    %cst_3 = arith.constant 6.400000e+01 : f32
    %10 = vector.broadcast %cst_3 : f32 to vector<32x1xf32>
    %11 = arith.divf %9, %10 : vector<32x1xf32>
    %12 = vector.broadcast %4 : vector<32x1xf32> to vector<32x64xf32>
    %13 = arith.subf %0, %12 : vector<32x64xf32>
    %cst_4 = arith.constant 9.99999974E-6 : f32
    %14 = vector.broadcast %cst_4 : f32 to vector<32x1xf32>
    %15 = arith.addf %11, %14 : vector<32x1xf32>
    %16 = math.rsqrt %15 : vector<32x1xf32>
    %17 = vector.broadcast %16 : vector<32x1xf32> to vector<32x64xf32>
    %18 = arith.mulf %13, %17 : vector<32x64xf32>
    %c0_5 = arith.constant 0 : index
    %c0_6 = arith.constant 0 : index
    %19 = vector.load %arg4[%c0_5, %c0_6] : memref<24x256xf32, #tpu.memory_space<vmem>>, vector<1x64xf32>
    %20 = vector.broadcast %19 : vector<1x64xf32> to vector<32x64xf32>
    %21 = arith.mulf %18, %20 : vector<32x64xf32>
    %c1 = arith.constant 1 : index
    %c0_7 = arith.constant 0 : index
    %22 = vector.load %arg4[%c1, %c0_7] : memref<24x256xf32, #tpu.memory_space<vmem>>, vector<1x64xf32>
    %23 = vector.broadcast %22 : vector<1x64xf32> to vector<32x64xf32>
    %24 = arith.addf %21, %23 : vector<32x64xf32>
    %c0_8 = arith.constant 0 : index
    %c0_9 = arith.constant 0 : index
    %25 = vector.load %arg2[%c0_8, %c0_9] : memref<64x1280xf32, #tpu.memory_space<vmem>>, vector<64x256xf32>
    %cst_10 = arith.constant dense<0.000000e+00> : vector<32x256xf32>
    %26 = tpu.matmul %24, %25, %cst_10 {dimension_numbers = #tpu.dot_dimension_numbers<[1], [0], [0], [1], [0, 0, 1, 1], [], []>} : vector<32x64xf32>, vector<64x256xf32>, vector<32x256xf32> -> vector<32x256xf32>
    %c2 = arith.constant 2 : index
    %c0_11 = arith.constant 0 : index
    %27 = vector.load %arg4[%c2, %c0_11] : memref<24x256xf32, #tpu.memory_space<vmem>>, vector<1x256xf32>
    %28 = vector.broadcast %27 : vector<1x256xf32> to vector<32x256xf32>
    %29 = arith.addf %26, %28 : vector<32x256xf32>
    %30 = vector.extract_strided_slice %29 {offsets = [0, 0], sizes = [32, 128], strides = [1, 1]} : vector<32x256xf32> to vector<32x128xf32>
    %31 = vector.extract_strided_slice %29 {offsets = [0, 128], sizes = [32, 128], strides = [1, 1]} : vector<32x256xf32> to vector<32x128xf32>
    %cst_12 = arith.constant 0.000000e+00 : f32
    %32 = vector.broadcast %cst_12 : f32 to vector<32x128xf32>
    %33 = arith.subf %32, %31 : vector<32x128xf32>
    %34 = math.exp %33 : vector<32x128xf32>
    %cst_13 = arith.constant 1.000000e+00 : f32
    %35 = vector.broadcast %cst_13 : f32 to vector<32x128xf32>
    %36 = arith.addf %35, %34 : vector<32x128xf32>
    %cst_14 = arith.constant 1.000000e+00 : f32
    %37 = vector.broadcast %cst_14 : f32 to vector<32x128xf32>
    %38 = arith.divf %37, %36 : vector<32x128xf32>
    %39 = arith.mulf %31, %38 : vector<32x128xf32>
    %40 = arith.mulf %30, %39 : vector<32x128xf32>
    %c0_15 = arith.constant 0 : index
    %c0_16 = arith.constant 0 : index
    %41 = vector.load %arg3[%c0_15, %c0_16] : memref<128x256xf32, #tpu.memory_space<vmem>>, vector<128x64xf32>
    %cst_17 = arith.constant dense<0.000000e+00> : vector<32x64xf32>
    %42 = tpu.matmul %40, %41, %cst_17 {dimension_numbers = #tpu.dot_dimension_numbers<[1], [0], [0], [1], [0, 0, 1, 1], [], []>} : vector<32x128xf32>, vector<128x64xf32>, vector<32x64xf32> -> vector<32x64xf32>
    %c3 = arith.constant 3 : index
    %c0_18 = arith.constant 0 : index
    %43 = vector.load %arg4[%c3, %c0_18] : memref<24x256xf32, #tpu.memory_space<vmem>>, vector<1x64xf32>
    %44 = vector.broadcast %43 : vector<1x64xf32> to vector<32x64xf32>
    %45 = arith.addf %42, %44 : vector<32x64xf32>
    %cst_19 = arith.constant 5.000000e-01 : f32
    %46 = vector.broadcast %cst_19 : f32 to vector<32x64xf32>
    %47 = arith.mulf %46, %45 : vector<32x64xf32>
    %48 = arith.addf %0, %47 : vector<32x64xf32>
    %cst_20 = arith.constant dense<0.000000e+00> : vector<32xf32>
    %49 = vector.multi_reduction <add>, %48, %cst_20 [1] : vector<32x64xf32> to vector<32xf32>
    %50 = vector.shape_cast %49 : vector<32xf32> to vector<32x1xf32>
    %cst_21 = arith.constant 6.400000e+01 : f32
    %51 = vector.broadcast %cst_21 : f32 to vector<32x1xf32>
    %52 = arith.divf %50, %51 : vector<32x1xf32>
    %53 = vector.broadcast %52 : vector<32x1xf32> to vector<32x64xf32>
    %54 = arith.subf %48, %53 : vector<32x64xf32>
    %55 = arith.mulf %54, %54 : vector<32x64xf32>
    %cst_22 = arith.constant dense<0.000000e+00> : vector<32xf32>
    %56 = vector.multi_reduction <add>, %55, %cst_22 [1] : vector<32x64xf32> to vector<32xf32>
    %57 = vector.shape_cast %56 : vector<32xf32> to vector<32x1xf32>
    %cst_23 = arith.constant 6.400000e+01 : f32
    %58 = vector.broadcast %cst_23 : f32 to vector<32x1xf32>
    %59 = arith.divf %57, %58 : vector<32x1xf32>
    %60 = vector.broadcast %52 : vector<32x1xf32> to vector<32x64xf32>
    %61 = arith.subf %48, %60 : vector<32x64xf32>
    %cst_24 = arith.constant 9.99999974E-6 : f32
    %62 = vector.broadcast %cst_24 : f32 to vector<32x1xf32>
    %63 = arith.addf %59, %62 : vector<32x1xf32>
    %64 = math.rsqrt %63 : vector<32x1xf32>
    %65 = vector.broadcast %64 : vector<32x1xf32> to vector<32x64xf32>
    %66 = arith.mulf %61, %65 : vector<32x64xf32>
    %c4 = arith.constant 4 : index
    %c0_25 = arith.constant 0 : index
    %67 = vector.load %arg4[%c4, %c0_25] : memref<24x256xf32, #tpu.memory_space<vmem>>, vector<1x64xf32>
    %68 = vector.broadcast %67 : vector<1x64xf32> to vector<32x64xf32>
    %69 = arith.mulf %66, %68 : vector<32x64xf32>
    %c5 = arith.constant 5 : index
    %c0_26 = arith.constant 0 : index
    %70 = vector.load %arg4[%c5, %c0_26] : memref<24x256xf32, #tpu.memory_space<vmem>>, vector<1x64xf32>
    %71 = vector.broadcast %70 : vector<1x64xf32> to vector<32x64xf32>
    %72 = arith.addf %69, %71 : vector<32x64xf32>
    %c0_27 = arith.constant 0 : index
    %c256 = arith.constant 256 : index
    %73 = vector.load %arg2[%c0_27, %c256] : memref<64x1280xf32, #tpu.memory_space<vmem>>, vector<64x192xf32>
    %cst_28 = arith.constant dense<0.000000e+00> : vector<32x192xf32>
    %74 = tpu.matmul %72, %73, %cst_28 {dimension_numbers = #tpu.dot_dimension_numbers<[1], [0], [0], [1], [0, 0, 1, 1], [], []>} : vector<32x64xf32>, vector<64x192xf32>, vector<32x192xf32> -> vector<32x192xf32>
    %c6 = arith.constant 6 : index
    %c0_29 = arith.constant 0 : index
    %75 = vector.load %arg4[%c6, %c0_29] : memref<24x256xf32, #tpu.memory_space<vmem>>, vector<1x192xf32>
    %76 = vector.broadcast %75 : vector<1x192xf32> to vector<32x192xf32>
    %77 = arith.addf %74, %76 : vector<32x192xf32>
    %78 = vector.extract_strided_slice %77 {offsets = [0, 0], sizes = [32, 16], strides = [1, 1]} : vector<32x192xf32> to vector<32x16xf32>
    %79 = vector.extract_strided_slice %77 {offsets = [0, 16], sizes = [32, 16], strides = [1, 1]} : vector<32x192xf32> to vector<32x16xf32>
    %80 = vector.extract_strided_slice %77 {offsets = [0, 32], sizes = [32, 16], strides = [1, 1]} : vector<32x192xf32> to vector<32x16xf32>
    %81 = vector.extract_strided_slice %77 {offsets = [0, 48], sizes = [32, 16], strides = [1, 1]} : vector<32x192xf32> to vector<32x16xf32>
    %82 = tpu.concatenate %78, %79, %80, %81 in 0 : vector<32x16xf32>, vector<32x16xf32>, vector<32x16xf32>, vector<32x16xf32> -> vector<128x16xf32>
    %83 = vector.extract_strided_slice %77 {offsets = [0, 64], sizes = [32, 16], strides = [1, 1]} : vector<32x192xf32> to vector<32x16xf32>
    %84 = vector.extract_strided_slice %77 {offsets = [0, 80], sizes = [32, 16], strides = [1, 1]} : vector<32x192xf32> to vector<32x16xf32>
    %85 = vector.extract_strided_slice %77 {offsets = [0, 96], sizes = [32, 16], strides = [1, 1]} : vector<32x192xf32> to vector<32x16xf32>
    %86 = vector.extract_strided_slice %77 {offsets = [0, 112], sizes = [32, 16], strides = [1, 1]} : vector<32x192xf32> to vector<32x16xf32>
    %87 = tpu.concatenate %83, %84, %85, %86 in 0 : vector<32x16xf32>, vector<32x16xf32>, vector<32x16xf32>, vector<32x16xf32> -> vector<128x16xf32>
    %88 = vector.extract_strided_slice %77 {offsets = [0, 128], sizes = [32, 16], strides = [1, 1]} : vector<32x192xf32> to vector<32x16xf32>
    %89 = vector.extract_strided_slice %77 {offsets = [0, 144], sizes = [32, 16], strides = [1, 1]} : vector<32x192xf32> to vector<32x16xf32>
    %90 = vector.extract_strided_slice %77 {offsets = [0, 160], sizes = [32, 16], strides = [1, 1]} : vector<32x192xf32> to vector<32x16xf32>
    %91 = vector.extract_strided_slice %77 {offsets = [0, 176], sizes = [32, 16], strides = [1, 1]} : vector<32x192xf32> to vector<32x16xf32>
    %92 = tpu.concatenate %88, %89, %90, %91 in 0 : vector<32x16xf32>, vector<32x16xf32>, vector<32x16xf32>, vector<32x16xf32> -> vector<128x16xf32>
    %cst_30 = arith.constant dense<0.000000e+00> : vector<128x128xf32>
    %93 = tpu.matmul %82, %87, %cst_30 {dimension_numbers = #tpu.dot_dimension_numbers<[1], [1], [0], [0], [0, 0, 1, 0], [], []>} : vector<128x16xf32>, vector<128x16xf32>, vector<128x128xf32> -> vector<128x128xf32>
    %c0_31 = arith.constant 0 : index
    %c0_32 = arith.constant 0 : index
    %94 = vector.load %arg1[%c0_31, %c0_32] : memref<128x128xf32, #tpu.memory_space<vmem>>, vector<128x128xf32>
    %95 = arith.addf %93, %94 : vector<128x128xf32>
    %cst_33 = arith.constant dense<0xFF800000> : vector<128xf32>
    %96 = vector.multi_reduction <maximumf>, %95, %cst_33 [1] : vector<128x128xf32> to vector<128xf32>
    %97 = vector.shape_cast %96 : vector<128xf32> to vector<128x1xf32>
    %98 = vector.broadcast %97 : vector<128x1xf32> to vector<128x128xf32>
    %99 = arith.subf %95, %98 : vector<128x128xf32>
    %100 = math.exp %99 : vector<128x128xf32>
    %cst_34 = arith.constant dense<0.000000e+00> : vector<128xf32>
    %101 = vector.multi_reduction <add>, %100, %cst_34 [1] : vector<128x128xf32> to vector<128xf32>
    %102 = vector.shape_cast %101 : vector<128xf32> to vector<128x1xf32>
    %103 = tpu.reciprocal %102 {approx = true} : vector<128x1xf32> -> vector<128x1xf32>
    %104 = vector.broadcast %103 : vector<128x1xf32> to vector<128x128xf32>
    %105 = arith.mulf %100, %104 : vector<128x128xf32>
    %cst_35 = arith.constant dense<0.000000e+00> : vector<128x16xf32>
    %106 = tpu.matmul %105, %92, %cst_35 {dimension_numbers = #tpu.dot_dimension_numbers<[1], [0], [0], [1], [0, 0, 1, 1], [], []>} : vector<128x128xf32>, vector<128x16xf32>, vector<128x16xf32> -> vector<128x16xf32>
    %107 = vector.extract_strided_slice %106 {offsets = [0, 0], sizes = [32, 16], strides = [1, 1]} : vector<128x16xf32> to vector<32x16xf32>
    %c0_36 = arith.constant 0 : index
    %c512 = arith.constant 512 : index
    %108 = vector.load %arg2[%c0_36, %c512] : memref<64x1280xf32, #tpu.memory_space<vmem>>, vector<16x64xf32>
    %cst_37 = arith.constant dense<0.000000e+00> : vector<32x64xf32>
    %109 = tpu.matmul %107, %108, %cst_37 {dimension_numbers = #tpu.dot_dimension_numbers<[1], [0], [0], [1], [0, 0, 1, 1], [], []>} : vector<32x16xf32>, vector<16x64xf32>, vector<32x64xf32> -> vector<32x64xf32>
    %110 = vector.extract_strided_slice %106 {offsets = [32, 0], sizes = [32, 16], strides = [1, 1]} : vector<128x16xf32> to vector<32x16xf32>
    %c16 = arith.constant 16 : index
    %c512_38 = arith.constant 512 : index
    %111 = vector.load %arg2[%c16, %c512_38] : memref<64x1280xf32, #tpu.memory_space<vmem>>, vector<16x64xf32>
    %cst_39 = arith.constant dense<0.000000e+00> : vector<32x64xf32>
    %112 = tpu.matmul %110, %111, %cst_39 {dimension_numbers = #tpu.dot_dimension_numbers<[1], [0], [0], [1], [0, 0, 1, 1], [], []>} : vector<32x16xf32>, vector<16x64xf32>, vector<32x64xf32> -> vector<32x64xf32>
    %113 = arith.addf %109, %112 : vector<32x64xf32>
    %114 = vector.extract_strided_slice %106 {offsets = [64, 0], sizes = [32, 16], strides = [1, 1]} : vector<128x16xf32> to vector<32x16xf32>
    %c32 = arith.constant 32 : index
    %c512_40 = arith.constant 512 : index
    %115 = vector.load %arg2[%c32, %c512_40] : memref<64x1280xf32, #tpu.memory_space<vmem>>, vector<16x64xf32>
    %cst_41 = arith.constant dense<0.000000e+00> : vector<32x64xf32>
    %116 = tpu.matmul %114, %115, %cst_41 {dimension_numbers = #tpu.dot_dimension_numbers<[1], [0], [0], [1], [0, 0, 1, 1], [], []>} : vector<32x16xf32>, vector<16x64xf32>, vector<32x64xf32> -> vector<32x64xf32>
    %117 = arith.addf %113, %116 : vector<32x64xf32>
    %118 = vector.extract_strided_slice %106 {offsets = [96, 0], sizes = [32, 16], strides = [1, 1]} : vector<128x16xf32> to vector<32x16xf32>
    %c48 = arith.constant 48 : index
    %c512_42 = arith.constant 512 : index
    %119 = vector.load %arg2[%c48, %c512_42] : memref<64x1280xf32, #tpu.memory_space<vmem>>, vector<16x64xf32>
    %cst_43 = arith.constant dense<0.000000e+00> : vector<32x64xf32>
    %120 = tpu.matmul %118, %119, %cst_43 {dimension_numbers = #tpu.dot_dimension_numbers<[1], [0], [0], [1], [0, 0, 1, 1], [], []>} : vector<32x16xf32>, vector<16x64xf32>, vector<32x64xf32> -> vector<32x64xf32>
    %121 = arith.addf %117, %120 : vector<32x64xf32>
    %122 = arith.addf %48, %121 : vector<32x64xf32>
    %c7 = arith.constant 7 : index
    %c0_44 = arith.constant 0 : index
    %123 = vector.load %arg4[%c7, %c0_44] : memref<24x256xf32, #tpu.memory_space<vmem>>, vector<1x64xf32>
    %124 = vector.broadcast %123 : vector<1x64xf32> to vector<32x64xf32>
    %125 = arith.addf %122, %124 : vector<32x64xf32>
    %cst_45 = arith.constant dense<0.000000e+00> : vector<32xf32>
    %126 = vector.multi_reduction <add>, %125, %cst_45 [1] : vector<32x64xf32> to vector<32xf32>
    %127 = vector.shape_cast %126 : vector<32xf32> to vector<32x1xf32>
    %cst_46 = arith.constant 6.400000e+01 : f32
    %128 = vector.broadcast %cst_46 : f32 to vector<32x1xf32>
    %129 = arith.divf %127, %128 : vector<32x1xf32>
    %130 = vector.broadcast %129 : vector<32x1xf32> to vector<32x64xf32>
    %131 = arith.subf %125, %130 : vector<32x64xf32>
    %132 = arith.mulf %131, %131 : vector<32x64xf32>
    %cst_47 = arith.constant dense<0.000000e+00> : vector<32xf32>
    %133 = vector.multi_reduction <add>, %132, %cst_47 [1] : vector<32x64xf32> to vector<32xf32>
    %134 = vector.shape_cast %133 : vector<32xf32> to vector<32x1xf32>
    %cst_48 = arith.constant 6.400000e+01 : f32
    %135 = vector.broadcast %cst_48 : f32 to vector<32x1xf32>
    %136 = arith.divf %134, %135 : vector<32x1xf32>
    %137 = vector.broadcast %129 : vector<32x1xf32> to vector<32x64xf32>
    %138 = arith.subf %125, %137 : vector<32x64xf32>
    %cst_49 = arith.constant 9.99999974E-6 : f32
    %139 = vector.broadcast %cst_49 : f32 to vector<32x1xf32>
    %140 = arith.addf %136, %139 : vector<32x1xf32>
    %141 = math.rsqrt %140 : vector<32x1xf32>
    %142 = vector.broadcast %141 : vector<32x1xf32> to vector<32x64xf32>
    %143 = arith.mulf %138, %142 : vector<32x64xf32>
    %c8 = arith.constant 8 : index
    %c0_50 = arith.constant 0 : index
    %144 = vector.load %arg4[%c8, %c0_50] : memref<24x256xf32, #tpu.memory_space<vmem>>, vector<1x64xf32>
    %145 = vector.broadcast %144 : vector<1x64xf32> to vector<32x64xf32>
    %146 = arith.mulf %143, %145 : vector<32x64xf32>
    %c9 = arith.constant 9 : index
    %c0_51 = arith.constant 0 : index
    %147 = vector.load %arg4[%c9, %c0_51] : memref<24x256xf32, #tpu.memory_space<vmem>>, vector<1x64xf32>
    %148 = vector.broadcast %147 : vector<1x64xf32> to vector<32x64xf32>
    %149 = arith.addf %146, %148 : vector<32x64xf32>
    %c0_52 = arith.constant 0 : index
    %c640 = arith.constant 640 : index
    %150 = vector.load %arg2[%c0_52, %c640] : memref<64x1280xf32, #tpu.memory_space<vmem>>, vector<64x128xf32>
    %cst_53 = arith.constant dense<0.000000e+00> : vector<32x128xf32>
    %151 = tpu.matmul %149, %150, %cst_53 {dimension_numbers = #tpu.dot_dimension_numbers<[1], [0], [0], [1], [0, 0, 1, 1], [], []>} : vector<32x64xf32>, vector<64x128xf32>, vector<32x128xf32> -> vector<32x128xf32>
    %c10 = arith.constant 10 : index
    %c0_54 = arith.constant 0 : index
    %152 = vector.load %arg4[%c10, %c0_54] : memref<24x256xf32, #tpu.memory_space<vmem>>, vector<1x128xf32>
    %153 = vector.broadcast %152 : vector<1x128xf32> to vector<32x128xf32>
    %154 = arith.addf %151, %153 : vector<32x128xf32>
    %155 = vector.extract_strided_slice %154 {offsets = [0, 0], sizes = [32, 64], strides = [1, 1]} : vector<32x128xf32> to vector<32x64xf32>
    %156 = vector.extract_strided_slice %154 {offsets = [0, 64], sizes = [32, 64], strides = [1, 1]} : vector<32x128xf32> to vector<32x64xf32>
    %cst_55 = arith.constant 0.000000e+00 : f32
    %157 = vector.broadcast %cst_55 : f32 to vector<32x64xf32>
    %158 = arith.subf %157, %156 : vector<32x64xf32>
    %159 = math.exp %158 : vector<32x64xf32>
    %cst_56 = arith.constant 1.000000e+00 : f32
    %160 = vector.broadcast %cst_56 : f32 to vector<32x64xf32>
    %161 = arith.addf %160, %159 : vector<32x64xf32>
    %cst_57 = arith.constant 1.000000e+00 : f32
    %162 = vector.broadcast %cst_57 : f32 to vector<32x64xf32>
    %163 = arith.divf %162, %161 : vector<32x64xf32>
    %164 = arith.mulf %155, %163 : vector<32x64xf32>
    %165 = tpu.iota {dimensions = array<i32: 0>} : vector<32x64xi32>
    %c15_i32 = arith.constant 15 : i32
    %166 = vector.broadcast %c15_i32 : i32 to vector<32x64xi32>
    %167 = arith.andi %165, %166 : vector<32x64xi32>
    %c22 = arith.constant 22 : index
    %c0_58 = arith.constant 0 : index
    %168 = vector.load %arg4[%c22, %c0_58] : memref<24x256xf32, #tpu.memory_space<vmem>>, vector<1x64xf32>
    %169 = vector.broadcast %168 : vector<1x64xf32> to vector<32x64xf32>
    %170 = arith.mulf %164, %169 : vector<32x64xf32>
    %c1_i32 = arith.constant 1 : i32
    %171 = vector.broadcast %c1_i32 : i32 to vector<32x64xi32>
    %172 = arith.cmpi sge, %167, %171 : vector<32x64xi32>
    %c1_i32_59 = arith.constant 1 : i32
    %173 = tpu.dynamic_rotate %164 by %c1_i32_59 dim 0 : vector<32x64xf32>, i32 -> vector<32x64xf32>
    %cst_60 = arith.constant 0.000000e+00 : f32
    %174 = vector.broadcast %cst_60 : f32 to vector<32x64xf32>
    %175 = arith.select %172, %173, %174 : vector<32x64xi1>, vector<32x64xf32>
    %c21 = arith.constant 21 : index
    %c0_61 = arith.constant 0 : index
    %176 = vector.load %arg4[%c21, %c0_61] : memref<24x256xf32, #tpu.memory_space<vmem>>, vector<1x64xf32>
    %177 = vector.broadcast %176 : vector<1x64xf32> to vector<32x64xf32>
    %178 = arith.mulf %175, %177 : vector<32x64xf32>
    %179 = arith.addf %170, %178 : vector<32x64xf32>
    %c2_i32 = arith.constant 2 : i32
    %180 = vector.broadcast %c2_i32 : i32 to vector<32x64xi32>
    %181 = arith.cmpi sge, %167, %180 : vector<32x64xi32>
    %c2_i32_62 = arith.constant 2 : i32
    %182 = tpu.dynamic_rotate %164 by %c2_i32_62 dim 0 : vector<32x64xf32>, i32 -> vector<32x64xf32>
    %cst_63 = arith.constant 0.000000e+00 : f32
    %183 = vector.broadcast %cst_63 : f32 to vector<32x64xf32>
    %184 = arith.select %181, %182, %183 : vector<32x64xi1>, vector<32x64xf32>
    %c20 = arith.constant 20 : index
    %c0_64 = arith.constant 0 : index
    %185 = vector.load %arg4[%c20, %c0_64] : memref<24x256xf32, #tpu.memory_space<vmem>>, vector<1x64xf32>
    %186 = vector.broadcast %185 : vector<1x64xf32> to vector<32x64xf32>
    %187 = arith.mulf %184, %186 : vector<32x64xf32>
    %188 = arith.addf %179, %187 : vector<32x64xf32>
    %c11 = arith.constant 11 : index
    %c0_65 = arith.constant 0 : index
    %189 = vector.load %arg4[%c11, %c0_65] : memref<24x256xf32, #tpu.memory_space<vmem>>, vector<1x64xf32>
    %190 = vector.broadcast %189 : vector<1x64xf32> to vector<32x64xf32>
    %191 = arith.addf %188, %190 : vector<32x64xf32>
    %c0_66 = arith.constant 0 : index
    %c768 = arith.constant 768 : index
    %192 = vector.load %arg2[%c0_66, %c768] : memref<64x1280xf32, #tpu.memory_space<vmem>>, vector<64x64xf32>
    %cst_67 = arith.constant dense<0.000000e+00> : vector<32x64xf32>
    %193 = tpu.matmul %191, %192, %cst_67 {dimension_numbers = #tpu.dot_dimension_numbers<[1], [0], [0], [1], [0, 0, 1, 1], [], []>} : vector<32x64xf32>, vector<64x64xf32>, vector<32x64xf32> -> vector<32x64xf32>
    %c12 = arith.constant 12 : index
    %c0_68 = arith.constant 0 : index
    %194 = vector.load %arg4[%c12, %c0_68] : memref<24x256xf32, #tpu.memory_space<vmem>>, vector<1x64xf32>
    %195 = vector.broadcast %194 : vector<1x64xf32> to vector<32x64xf32>
    %196 = arith.addf %193, %195 : vector<32x64xf32>
    %cst_69 = arith.constant 0.000000e+00 : f32
    %197 = vector.broadcast %cst_69 : f32 to vector<32x64xf32>
    %198 = arith.maximumf %196, %197 : vector<32x64xf32>
    %c0_70 = arith.constant 0 : index
    %c896 = arith.constant 896 : index
    %199 = vector.load %arg2[%c0_70, %c896] : memref<64x1280xf32, #tpu.memory_space<vmem>>, vector<64x64xf32>
    %cst_71 = arith.constant dense<0.000000e+00> : vector<32x64xf32>
    %200 = tpu.matmul %198, %199, %cst_71 {dimension_numbers = #tpu.dot_dimension_numbers<[1], [0], [0], [1], [0, 0, 1, 1], [], []>} : vector<32x64xf32>, vector<64x64xf32>, vector<32x64xf32> -> vector<32x64xf32>
    %201 = arith.addf %125, %200 : vector<32x64xf32>
    %c13 = arith.constant 13 : index
    %c0_72 = arith.constant 0 : index
    %202 = vector.load %arg4[%c13, %c0_72] : memref<24x256xf32, #tpu.memory_space<vmem>>, vector<1x64xf32>
    %203 = vector.broadcast %202 : vector<1x64xf32> to vector<32x64xf32>
    %204 = arith.addf %201, %203 : vector<32x64xf32>
    %cst_73 = arith.constant dense<0.000000e+00> : vector<32xf32>
    %205 = vector.multi_reduction <add>, %204, %cst_73 [1] : vector<32x64xf32> to vector<32xf32>
    %206 = vector.shape_cast %205 : vector<32xf32> to vector<32x1xf32>
    %cst_74 = arith.constant 6.400000e+01 : f32
    %207 = vector.broadcast %cst_74 : f32 to vector<32x1xf32>
    %208 = arith.divf %206, %207 : vector<32x1xf32>
    %209 = vector.broadcast %208 : vector<32x1xf32> to vector<32x64xf32>
    %210 = arith.subf %204, %209 : vector<32x64xf32>
    %211 = arith.mulf %210, %210 : vector<32x64xf32>
    %cst_75 = arith.constant dense<0.000000e+00> : vector<32xf32>
    %212 = vector.multi_reduction <add>, %211, %cst_75 [1] : vector<32x64xf32> to vector<32xf32>
    %213 = vector.shape_cast %212 : vector<32xf32> to vector<32x1xf32>
    %cst_76 = arith.constant 6.400000e+01 : f32
    %214 = vector.broadcast %cst_76 : f32 to vector<32x1xf32>
    %215 = arith.divf %213, %214 : vector<32x1xf32>
    %216 = vector.broadcast %208 : vector<32x1xf32> to vector<32x64xf32>
    %217 = arith.subf %204, %216 : vector<32x64xf32>
    %cst_77 = arith.constant 9.99999974E-6 : f32
    %218 = vector.broadcast %cst_77 : f32 to vector<32x1xf32>
    %219 = arith.addf %215, %218 : vector<32x1xf32>
    %220 = math.rsqrt %219 : vector<32x1xf32>
    %221 = vector.broadcast %220 : vector<32x1xf32> to vector<32x64xf32>
    %222 = arith.mulf %217, %221 : vector<32x64xf32>
    %c14 = arith.constant 14 : index
    %c0_78 = arith.constant 0 : index
    %223 = vector.load %arg4[%c14, %c0_78] : memref<24x256xf32, #tpu.memory_space<vmem>>, vector<1x64xf32>
    %224 = vector.broadcast %223 : vector<1x64xf32> to vector<32x64xf32>
    %225 = arith.mulf %222, %224 : vector<32x64xf32>
    %c15 = arith.constant 15 : index
    %c0_79 = arith.constant 0 : index
    %226 = vector.load %arg4[%c15, %c0_79] : memref<24x256xf32, #tpu.memory_space<vmem>>, vector<1x64xf32>
    %227 = vector.broadcast %226 : vector<1x64xf32> to vector<32x64xf32>
    %228 = arith.addf %225, %227 : vector<32x64xf32>
    %c0_80 = arith.constant 0 : index
    %c1024 = arith.constant 1024 : index
    %229 = vector.load %arg2[%c0_80, %c1024] : memref<64x1280xf32, #tpu.memory_space<vmem>>, vector<64x256xf32>
    %cst_81 = arith.constant dense<0.000000e+00> : vector<32x256xf32>
    %230 = tpu.matmul %228, %229, %cst_81 {dimension_numbers = #tpu.dot_dimension_numbers<[1], [0], [0], [1], [0, 0, 1, 1], [], []>} : vector<32x64xf32>, vector<64x256xf32>, vector<32x256xf32> -> vector<32x256xf32>
    %c16_82 = arith.constant 16 : index
    %c0_83 = arith.constant 0 : index
    %231 = vector.load %arg4[%c16_82, %c0_83] : memref<24x256xf32, #tpu.memory_space<vmem>>, vector<1x256xf32>
    %232 = vector.broadcast %231 : vector<1x256xf32> to vector<32x256xf32>
    %233 = arith.addf %230, %232 : vector<32x256xf32>
    %234 = vector.extract_strided_slice %233 {offsets = [0, 0], sizes = [32, 128], strides = [1, 1]} : vector<32x256xf32> to vector<32x128xf32>
    %235 = vector.extract_strided_slice %233 {offsets = [0, 128], sizes = [32, 128], strides = [1, 1]} : vector<32x256xf32> to vector<32x128xf32>
    %cst_84 = arith.constant 0.000000e+00 : f32
    %236 = vector.broadcast %cst_84 : f32 to vector<32x128xf32>
    %237 = arith.subf %236, %235 : vector<32x128xf32>
    %238 = math.exp %237 : vector<32x128xf32>
    %cst_85 = arith.constant 1.000000e+00 : f32
    %239 = vector.broadcast %cst_85 : f32 to vector<32x128xf32>
    %240 = arith.addf %239, %238 : vector<32x128xf32>
    %cst_86 = arith.constant 1.000000e+00 : f32
    %241 = vector.broadcast %cst_86 : f32 to vector<32x128xf32>
    %242 = arith.divf %241, %240 : vector<32x128xf32>
    %243 = arith.mulf %235, %242 : vector<32x128xf32>
    %244 = arith.mulf %234, %243 : vector<32x128xf32>
    %c0_87 = arith.constant 0 : index
    %c128 = arith.constant 128 : index
    %245 = vector.load %arg3[%c0_87, %c128] : memref<128x256xf32, #tpu.memory_space<vmem>>, vector<128x64xf32>
    %cst_88 = arith.constant dense<0.000000e+00> : vector<32x64xf32>
    %246 = tpu.matmul %244, %245, %cst_88 {dimension_numbers = #tpu.dot_dimension_numbers<[1], [0], [0], [1], [0, 0, 1, 1], [], []>} : vector<32x128xf32>, vector<128x64xf32>, vector<32x64xf32> -> vector<32x64xf32>
    %c17 = arith.constant 17 : index
    %c0_89 = arith.constant 0 : index
    %247 = vector.load %arg4[%c17, %c0_89] : memref<24x256xf32, #tpu.memory_space<vmem>>, vector<1x64xf32>
    %248 = vector.broadcast %247 : vector<1x64xf32> to vector<32x64xf32>
    %249 = arith.addf %246, %248 : vector<32x64xf32>
    %cst_90 = arith.constant 5.000000e-01 : f32
    %250 = vector.broadcast %cst_90 : f32 to vector<32x64xf32>
    %251 = arith.mulf %250, %249 : vector<32x64xf32>
    %252 = arith.addf %204, %251 : vector<32x64xf32>
    %cst_91 = arith.constant dense<0.000000e+00> : vector<32xf32>
    %253 = vector.multi_reduction <add>, %252, %cst_91 [1] : vector<32x64xf32> to vector<32xf32>
    %254 = vector.shape_cast %253 : vector<32xf32> to vector<32x1xf32>
    %cst_92 = arith.constant 6.400000e+01 : f32
    %255 = vector.broadcast %cst_92 : f32 to vector<32x1xf32>
    %256 = arith.divf %254, %255 : vector<32x1xf32>
    %257 = vector.broadcast %256 : vector<32x1xf32> to vector<32x64xf32>
    %258 = arith.subf %252, %257 : vector<32x64xf32>
    %259 = arith.mulf %258, %258 : vector<32x64xf32>
    %cst_93 = arith.constant dense<0.000000e+00> : vector<32xf32>
    %260 = vector.multi_reduction <add>, %259, %cst_93 [1] : vector<32x64xf32> to vector<32xf32>
    %261 = vector.shape_cast %260 : vector<32xf32> to vector<32x1xf32>
    %cst_94 = arith.constant 6.400000e+01 : f32
    %262 = vector.broadcast %cst_94 : f32 to vector<32x1xf32>
    %263 = arith.divf %261, %262 : vector<32x1xf32>
    %264 = vector.broadcast %256 : vector<32x1xf32> to vector<32x64xf32>
    %265 = arith.subf %252, %264 : vector<32x64xf32>
    %cst_95 = arith.constant 9.99999974E-6 : f32
    %266 = vector.broadcast %cst_95 : f32 to vector<32x1xf32>
    %267 = arith.addf %263, %266 : vector<32x1xf32>
    %268 = math.rsqrt %267 : vector<32x1xf32>
    %269 = vector.broadcast %268 : vector<32x1xf32> to vector<32x64xf32>
    %270 = arith.mulf %265, %269 : vector<32x64xf32>
    %c18 = arith.constant 18 : index
    %c0_96 = arith.constant 0 : index
    %271 = vector.load %arg4[%c18, %c0_96] : memref<24x256xf32, #tpu.memory_space<vmem>>, vector<1x64xf32>
    %272 = vector.broadcast %271 : vector<1x64xf32> to vector<32x64xf32>
    %273 = arith.mulf %270, %272 : vector<32x64xf32>
    %c19 = arith.constant 19 : index
    %c0_97 = arith.constant 0 : index
    %274 = vector.load %arg4[%c19, %c0_97] : memref<24x256xf32, #tpu.memory_space<vmem>>, vector<1x64xf32>
    %275 = vector.broadcast %274 : vector<1x64xf32> to vector<32x64xf32>
    %276 = arith.addf %273, %275 : vector<32x64xf32>
    %c0_98 = arith.constant 0 : index
    %c0_99 = arith.constant 0 : index
    %277 = vector.load %arg5[%c0_98, %c0_99] : memref<32x64xf32, #tpu.memory_space<vmem>>, vector<32x64xf32>
    tpu.vector_store %arg5[%c0_98, %c0_99], %276 {strides = array<i32>} : memref<32x64xf32, #tpu.memory_space<vmem>>, vector<32x64xf32>,
    return
  }
}

</mosaic_0001>

<bundles_post_ra>
// kernel: tpu_custom_call.1
= control target key start
LH: loop header
LB: loop body
LE: loop exit
PB: predicated region body
PF: predicated region fallthrough
CT: control target
= control target key end

     0   :  { %10 = vsyncpa [#allocation3], 0  ;;  %s4500_s0 = inlined_call_operand.hbm [shape: f32[32,64], index: 0, kind: input, shape index: {}]   ;;  %s4501_s1 = inlined_call_operand.hbm [shape: f32[128,128], index: 1, kind: input, shape index: {}]   ;;  %s4502_s2 = inlined_call_operand.hbm [shape: f32[64,1280], index: 2, kind: input, shape index: {}]   ;;  %s4503_s3 = inlined_call_operand.hbm [shape: f32[128,256], index: 3, kind: input, shape index: {}]   ;;  %s4504_s4 = inlined_call_operand.hbm [shape: f32[24,256], index: 4, kind: input, shape index: {}]   ;;  %s4505_s5 = inlined_call_operand.hbm [shape: f32[32,64], index: 5, kind: output, shape index: {}]  }
   0x1   :  { %11 = vsyncpa [#allocation6], 0 }
   0x2   :  { %12 = vsyncpa [#allocation9], 0 }
   0x3   :  { %13 = vsyncpa [#allocation4], 0  ;;  %s3751_s18 = smov [#allocation5]   ;;  %s3752_s20 = smov [#allocation8]  }
   0x4   :  { %s31_s19 = sshll.u32 %s3751_s18, 4  ;;  %s55_s21 = sshll.u32 %s3752_s20, 4  ;;  %s32_s19 = int_to_ptr.vmem [resolvable:$true] %s31_s19  ;;  %s3797_s21 = int_to_ptr.vmem [resolvable:$true] %s55_s21 }
   0x5   :  { %s3611_s24 = scalar_lea.hbm %s4501_s1, 2048 }
   0x6   :  { %p3612_p0 = scmp.ne.s32.totalorder %s4501_s1, %s3611_s24  ;;  %p3615_p1 = scmp.lt.u32.totalorder %s3611_s24, %s4501_s1 }
   0x8   :  { %p3617_p2 = pnand %p3615_p1, %p3612_p0 }
   0xa   :  { %3620 = shalt.err (!%p3617_p2)
}
   0xb   :  { %s3621_s29 = scalar_lea.vmem %s32_s19, 2048  ;;  %p3626_p4 = scmp.lt.s32.totalorder %s32_s19, %s32_s19 }
   0xc   :  { %p3622_p3 = scmp.ne.s32.totalorder %s32_s19, %s3621_s29  ;;  %p3627_p5 = scmp.lt.s32.totalorder %s3621_s29, %s3621_s29 }
   0xe   :  { %p3628_p6 = por %p3627_p5, %p3626_p4 }
  0x10   :  { %p3629_p7 = pnand %p3628_p6, %p3622_p3 }
  0x12   :  { %3632 = shalt.err (!%p3629_p7)
}
  0x13   :  { %s3753_s30 = smov 128   ;;  %s3754_s6 = smov 8  }
  0x14   :  { %37 = dma.hbm_to_vmem [thread:$0]  %s4501_s1, 2048, %s32_s19, [#allocation6], %s3753_s30, %s3753_s30, %s3754_s6  }
  0x15   :  { %s3633_s11 = scalar_lea.hbm %s4503_s3, 4096 }
  0x16   :  { %p3634_p8 = scmp.ne.s32.totalorder %s4503_s3, %s3633_s11  ;;  %p3637_p9 = scmp.lt.u32.totalorder %s3633_s11, %s4503_s3 }
  0x18   :  { %p3639_p10 = pnand %p3637_p9, %p3634_p8 }
  0x1a   :  { %3642 = shalt.err (!%p3639_p10)
}
  0x1b   :  { %s3643_s16 = scalar_lea.vmem %s3797_s21, 4096  ;;  %p3648_p12 = scmp.lt.s32.totalorder %s3797_s21, %s3797_s21 }
  0x1c   :  { %p3644_p11 = scmp.ne.s32.totalorder %s3797_s21, %s3643_s16  ;;  %p3649_p13 = scmp.lt.s32.totalorder %s3643_s16, %s3643_s16 }
  0x1e   :  { %p3650_p0 = por %p3649_p13, %p3648_p12 }
  0x20   :  { %p3651_p1 = pnand %p3650_p0, %p3644_p11 }
  0x22   :  { %3654 = shalt.err (!%p3651_p1)
}
  0x23   :  { %s3755_s1 = smov 256   ;;  %s3756_s17 = smov 16  }
  0x24   :  { %61 = dma.hbm_to_vmem [thread:$0]  %s4503_s3, 4096, %s3797_s21, [#allocation9], %s3755_s1, %s3755_s1, %s3756_s17  }
  0x25   :  { %s3757_s20 = smov [#allocation2]   ;;  %s3758_s23 = smov [#allocation7]  }
  0x26   :  { %s19_s22 = sshll.u32 %s3757_s20, 4  ;;  %s43_s24 = sshll.u32 %s3758_s23, 4  ;;  %s20_s22 = int_to_ptr.vmem [resolvable:$true] %s19_s22  ;;  %s3834_s24 = int_to_ptr.vmem [resolvable:$true] %s43_s24 }
  0x27   :  { %s3655_s27 = scalar_lea.hbm %s4500_s0, 512 }
  0x28   :  { %p3656_p2 = scmp.ne.s32.totalorder %s4500_s0, %s3655_s27  ;;  %p3659_p3 = scmp.lt.u32.totalorder %s3655_s27, %s4500_s0 }
  0x2a   :  { %p3661_p4 = pnand %p3659_p3, %p3656_p2 }
  0x2c   :  { %3664 = shalt.err (!%p3661_p4)
}
  0x2d   :  { %s3665_s3 = scalar_lea.vmem %s20_s22, 512  ;;  %p3670_p6 = scmp.lt.s32.totalorder %s20_s22, %s20_s22 }
  0x2e   :  { %p3666_p5 = scmp.ne.s32.totalorder %s20_s22, %s3665_s3  ;;  %p3671_p7 = scmp.lt.s32.totalorder %s3665_s3, %s3665_s3 }
  0x30   :  { %p3672_p8 = por %p3671_p7, %p3670_p6 }
  0x32   :  { %p3673_p9 = pnand %p3672_p8, %p3666_p5 }
  0x34   :  { %3676 = shalt.err (!%p3673_p9)
}
  0x35   :  { %25 = dma.hbm_to_vmem [thread:$0]  %s4500_s0, 512, %s20_s22, [#allocation3], %s3753_s30, %s3753_s30, %s3754_s6  }
  0x36   :  { %s3677_s12 = scalar_lea.hbm %s4502_s2, 10240 }
  0x37   :  { %p3678_p10 = scmp.ne.s32.totalorder %s4502_s2, %s3677_s12  ;;  %p3681_p11 = scmp.lt.u32.totalorder %s3677_s12, %s4502_s2 }
  0x39   :  { %p3683_p12 = pnand %p3681_p11, %p3678_p10 }
  0x3b   :  { %3686 = shalt.err (!%p3683_p12)
}
  0x3c   :  { %s3687_s18 = scalar_lea.vmem %s3834_s24, 10240  ;;  %p3692_p0 = scmp.lt.s32.totalorder %s3834_s24, %s3834_s24 }
  0x3d   :  { %p3688_p13 = scmp.ne.s32.totalorder %s3834_s24, %s3687_s18  ;;  %p3693_p1 = scmp.lt.s32.totalorder %s3687_s18, %s3687_s18 }
  0x3f   :  { %p3694_p2 = por %p3693_p1, %p3692_p0 }
  0x41   :  { %p3695_p3 = pnand %p3694_p2, %p3688_p13 }
  0x43   :  { %3698 = shalt.err (!%p3695_p3)
}
  0x44   :  { %s3759_s0 = smov 1280   ;;  %s3760_s19 = smov 80  }
  0x45   :  { %49 = dma.hbm_to_vmem [thread:$0]  %s4502_s2, 10240, %s3834_s24, [#allocation6], %s3759_s0, %s3759_s0, %s3760_s19  }
  0x46   :  { %s3761_s23 = smov [#allocation10]   ;;  %s3699_s28 = scalar_lea.hbm %s4504_s4, 768 }
  0x47   :  { %s67_s25 = sshll.u32 %s3761_s23, 4  ;;  %p3700_p4 = scmp.ne.s32.totalorder %s4504_s4, %s3699_s28  ;;  %s68_s25 = int_to_ptr.vmem [resolvable:$true] %s67_s25 }
  0x48   :  { %p3703_p5 = scmp.lt.u32.totalorder %s3699_s28, %s4504_s4 }
  0x4a   :  { %p3705_p6 = pnand %p3703_p5, %p3700_p4 }
  0x4c   :  { %3708 = shalt.err (!%p3705_p6)
}
  0x4d   :  { %s3709_s21 = scalar_lea.vmem %s68_s25, 768  ;;  %p3714_p8 = scmp.lt.s32.totalorder %s68_s25, %s68_s25 }
  0x4e   :  { %p3710_p7 = scmp.ne.s32.totalorder %s68_s25, %s3709_s21  ;;  %p3715_p9 = scmp.lt.s32.totalorder %s3709_s21, %s3709_s21 }
  0x50   :  { %p3716_p10 = por %p3715_p9, %p3714_p8 }
  0x52   :  { %p3717_p11 = pnand %p3716_p10, %p3710_p7 }
  0x54   :  { %3720 = shalt.err (!%p3717_p11)
}
  0x55   :  { %73 = dma.hbm_to_vmem [thread:$0]  %s4504_s4, 768, %s68_s25, [#allocation9], %s3755_s1, %s3755_s1, %s3756_s17  }
  0x56   :  { %3743 = dma.done.wait [#allocation3], 512  }
  0x57   :  { %3744 = vsyncadd [#allocation3], 4294966784 }
  0x58   :  { %3745 = dma.done.wait [#allocation6], 12288  }
  0x59   :  { %3746 = vsyncadd [#allocation6], 4294955008 }
  0x5a   :  { %3747 = dma.done.wait [#allocation9], 4864  }
  0x5b   :  { %3748 = vsyncadd [#allocation9], 4294962432  ;;  %vm93_vm0 = vcmask 523264   ;;  %v3884_v0 = vld [vmem:[#allocation2] sm:$0xff]  ;;  %v3886_v1 = vld [vmem:[#allocation2 + $0x10] sm:$0xff]  ;;  %v3762_v50 = vmov 0.0  }
  0x5c   :  { %v3888_v2 = vld [vmem:[#allocation2 + $0x8] sm:$0xff]  ;;  %v94_v3 = vsel %vm93_vm0, %v3884_v0, 0.0  ;;  %v100_v4 = vsel %vm93_vm0, %v3886_v1, 0.0  ;;  %v3894_v5 = vld [vmem:[#allocation2 + $0x18] sm:$0xff]  ;;  %v157_v31 = vld [vmem:[#allocation7] sm:$0xff]  ;;  %262 = vmatprep.mubr.f32.mxu0 %v3762_v50  ;;  %vm737_vm1 = vcmask 130048  }
  0x5d   :  { %95 = vadd.xlane.f32.xlu0 %v94_v3  ;;  %101 = vadd.xlane.f32.xlu1 %v100_v4  ;;  %v97_v6 = vsel %vm93_vm0, %v3888_v2, 0.0  ;;  %v103_v7 = vsel %vm93_vm0, %v3894_v5, 0.0  ;;  %v158_v28 = vld [vmem:[#allocation7 + $0x8] sm:$0xff]  ;;  %v160_v29 = vld [vmem:[#allocation7 + $0x58] sm:$0xff]  ;;  %v159_v32 = vld [vmem:[#allocation7 + $0x50] sm:$0xff]  ;;  %s3763_s4 = smov 112  }
  0x5e   :  { %v3105_v30 = vpack.c.bf16 %v160_v29, %v158_v28  ;;  %v3107_v33 = vpack.c.bf16 %v159_v32, %v157_v31  ;;  %v162_v34 = vld [vmem:[#allocation7 + $0xa8] sm:$0xff]  ;;  %v164_v35 = vld [vmem:[#allocation7 + $0xf8] sm:$0xff]  ;;  %v161_v37 = vld [vmem:[#allocation7 + $0xa0] sm:$0xff]  ;;  %s3764_s1 = smov 96   ;;  %s3765_s17 = smov 64  }
  0x5f   :  { %v3109_v36 = vpack.c.bf16 %v164_v35, %v162_v34  ;;  %v163_v38 = vld [vmem:[#allocation7 + $0xf0] sm:$0xff]  ;;  %v166_v40 = vld [vmem:[#allocation7 + $0x148] sm:$0xff]  ;;  %v168_v41 = vld [vmem:[#allocation7 + $0x198] sm:$0xff]  ;;  %s3766_s9 = smov [#allocation11]  }
  0x60   :  { %3106 = vmatprep.subr.bf16.mxu0 %v3105_v30  ;;  %v3111_v39 = vpack.c.bf16 %v163_v38, %v161_v37  ;;  %v3113_v42 = vpack.c.bf16 %v168_v41, %v166_v40  ;;  %v165_v43 = vld [vmem:[#allocation7 + $0x140] sm:$0xff]  ;;  %v167_v44 = vld [vmem:[#allocation7 + $0x190] sm:$0xff]  ;;  %v170_v45 = vld [vmem:[#allocation7 + $0x1e8] sm:$0xff]  ;;  %s2561_s10 = sshll.u32 %s3766_s9, 4  ;;  %s2562_s10 = int_to_ptr.vmem [resolvable:$true] %s2561_s10 }
  0x61   :  { %98 = vadd.xlane.f32.xlu0 %v97_v6  ;;  %104 = vadd.xlane.f32.xlu1 %v103_v7  ;;  %v3115_v46 = vpack.c.bf16 %v167_v44, %v165_v43  ;;  %v172_v47 = vld [vmem:[#allocation7 + $0x238] sm:$0xff]  ;;  %v169_v48 = vld [vmem:[#allocation7 + $0x1e0] sm:$0xff]  ;;  %v171_v49 = vld [vmem:[#allocation7 + $0x230] sm:$0xff]  ;;  %s3721_s11 = scalar_lea.vmem %s2562_s10, 512  ;;  %p3726_p13 = scmp.lt.s32.totalorder %s2562_s10, %s2562_s10 }
  0x62   :  { %3108 = vmatpush1.bf16.msra.mxu0 %v3107_v33  ;;  %v3117_v51 = vpack.c.bf16 %v172_v47, %v170_v45  ;;  %v3119_v52 = vpack.c.bf16 %v171_v49, %v169_v48  ;;  %v147_v6 = vld [vmem:[#allocation10] ss:$0 sm:$0xff]  ;;  %v324_v30 = vld [vmem:[#allocation8 + $0x50] sm:$0xff]  ;;  %v176_v47 = vlaneseq  ;;  %vm4074_vm2 = vmpackc.low %vm737_vm1, %vm737_vm1  ;;  %p3722_p12 = scmp.ne.s32.totalorder %s2562_s10, %s3721_s11  ;;  %p3727_p0 = scmp.lt.s32.totalorder %s3721_s11, %s3721_s11 }
  0x63   :  { %3110 = vmatprep.subr.bf16.mxu0 %v3109_v36  ;;  %v323_v29 = vld [vmem:[#allocation8 + $0x40] sm:$0xff]  ;;  %v326_v33 = vld [vmem:[#allocation8 + $0x70] sm:$0xff] }
  0x64   :  { %v3129_v31 = vpack.c.bf16 %v324_v30, %v323_v29  ;;  %v325_v32 = vld [vmem:[#allocation8 + $0x60] sm:$0xff]  ;;  %v328_v36 = vld [vmem:[#allocation8 + $0x90] sm:$0xff]  ;;  %v3937_v48 = vshrl.u32 %v176_v47, 7  ;;  %p3728_p1 = por %p3727_p0, %p3726_p13 }
  0x65   :  { %v3133_v34 = vpack.c.bf16 %v326_v33, %v325_v32  ;;  %v327_v35 = vld [vmem:[#allocation8 + $0x80] sm:$0xff]  ;;  %v334_v45 = vld [vmem:[#allocation8 + $0xf0] sm:$0xff] }
  0x66   :  { %3112 = vmatpush1.bf16.msra.mxu0 %v3111_v39  ;;  %v3137_v37 = vpack.c.bf16 %v328_v36, %v327_v35  ;;  %v329_v38 = vld [vmem:[#allocation8 + $0xa0] sm:$0xff]  ;;  %v330_v39 = vld [vmem:[#allocation8 + $0xb0] sm:$0xff]  ;;  %v3940_v49 = vsub.s32 1, %v3937_v48  ;;  %vm1883_vm3 = vcmp.lt.s32.totalorder %v3937_v48, 1  ;;  %vm1909_vm6 = vcmp.lt.s32.totalorder %v3937_v48, 2  ;;  %p3729_p2 = pnand %p3728_p1, %p3722_p12 }
  0x67   :  { %3114 = vmatprep.subr.bf16.mxu0 %v3113_v42  ;;  %v3141_v40 = vpack.c.bf16 %v330_v39, %v329_v38  ;;  %v331_v41 = vld [vmem:[#allocation8 + $0xc0] sm:$0xff]  ;;  %v332_v42 = vld [vmem:[#allocation8 + $0xd0] sm:$0xff] }
  0x68   :  { %v3145_v43 = vpack.c.bf16 %v332_v42, %v331_v41  ;;  %v333_v44 = vld [vmem:[#allocation8 + $0xe0] sm:$0xff] }
  0x69   :  { %v335_v39 = vld [vmem:[#allocation10 + $0x3] ss:$0 sm:$0xff] }
  0x6a   :  { %3116 = vmatpush1.bf16.msra.mxu0 %v3115_v46  ;;  %v3149_v46 = vpack.c.bf16 %v334_v45, %v333_v44 }
  0x6b   :  { %3118 = vmatprep.subr.bf16.mxu0 %v3117_v51  ;;  %v174_v51 = vld [vmem:[#allocation10 + $0x2] ss:$8 sm:$0x3] }
  0x6e   :  { %3120 = vmatpush1.bf16.msra.mxu0 %v3119_v52  ;;  %v183_v52 = vrot.slane %v174_v51, %v3940_v49 }
  0xea   :  { %v96_v8 = vpop.xlane.xlu0 %95  ;;  %v102_v9 = vpop.xlane.xlu1 %101 }
  0xeb   :  { %v107_v10 = vmul.f32 0.015625, %v96_v8  ;;  %v109_v11 = vmul.f32 0.015625, %v102_v9  ;;  %v152_v8 = vld [vmem:[#allocation10 + $0x1] ss:$0 sm:$0xff] }
  0xed   :  { %v3901_v12 = vsub.f32 %v3884_v0, %v107_v10  ;;  %v3904_v13 = vsub.f32 %v3886_v1, %v109_v11 }
  0xee   :  { %v99_v14 = vpop.xlane.xlu0 %98  ;;  %v105_v15 = vpop.xlane.xlu1 %104 }
  0xef   :  { %v108_v16 = vmul.f32 0.015625, %v99_v14  ;;  %v110_v17 = vmul.f32 0.015625, %v105_v15  ;;  %v115_v18 = vmul.f32 %v3901_v12, %v3901_v12  ;;  %v117_v19 = vmul.f32 %v3904_v13, %v3904_v13 }
  0xf1   :  { %v3911_v20 = vsub.f32 %v3888_v2, %v108_v16  ;;  %v3914_v21 = vsub.f32 %v3894_v5, %v110_v17  ;;  %v119_v22 = vsel %vm93_vm0, %v115_v18, 0.0  ;;  %v125_v23 = vsel %vm93_vm0, %v117_v19, 0.0 }
  0xf2   :  { %120 = vadd.xlane.f32.xlu0 %v119_v22 }
  0xf3   :  { %v116_v24 = vmul.f32 %v3911_v20, %v3911_v20  ;;  %v118_v25 = vmul.f32 %v3914_v21, %v3914_v21 }
  0xf5   :  { %v122_v26 = vsel %vm93_vm0, %v116_v24, 0.0  ;;  %v128_v27 = vsel %vm93_vm0, %v118_v25, 0.0  ;;  %v320_v25 = vld [vmem:[#allocation8 + $0x10] sm:$0xff] }
  0xf6   :  { %126 = vadd.xlane.f32.xlu0 %v125_v23  ;;  %123 = vadd.xlane.f32.xlu1 %v122_v26 }
  0xfa   :  { %129 = vadd.xlane.f32.xlu1 %v128_v27  ;;  %v322_v27 = vld [vmem:[#allocation8 + $0x30] sm:$0xff] }
 0x17f   :  { %v121_v53 = vpop.xlane.xlu0 %120 }
 0x180   :  { %v131_v54 = vmul.f32 0.015625, %v121_v53 }
 0x182   :  { %v135_v55 = vadd.f32 1e-05, %v131_v54 }
 0x183   :  { %v124_v56 = vpop.xlane.xlu1 %123  ;;  %v127_v57 = vpop.xlane.xlu0 %126 }
 0x184   :  { %3459 = vrsqrt.f32 %v135_v55  ;;  %v132_v58 = vmul.f32 0.015625, %v124_v56  ;;  %v133_v59 = vmul.f32 0.015625, %v127_v57 }
 0x186   :  { %v136_v60 = vadd.f32 1e-05, %v132_v58  ;;  %v137_v61 = vadd.f32 1e-05, %v133_v59 }
 0x187   :  { %v130_v62 = vpop.xlane.xlu1 %129 }
 0x188   :  { %3461 = vrsqrt.f32 %v136_v60  ;;  %v134_v63 = vmul.f32 0.015625, %v130_v62 }
 0x189   :  { %3463 = vrsqrt.f32 %v137_v61 }
 0x18a   :  { %v138_v3 = vadd.f32 1e-05, %v134_v63 }
 0x18c   :  { %3465 = vrsqrt.f32 %v138_v3 }
 0x18e   :  { %v3460_v4 = vpop.eup %3459 }
 0x18f   :  { %v143_v7 = vmul.f32 %v3460_v4, %v3901_v12 }
 0x191   :  { %v148_v9 = vmul.f32 %v147_v6, %v143_v7 }
 0x192   :  { %v3462_v10 = vpop.eup %3461 }
 0x193   :  { %v3464_v11 = vpop.eup %3463  ;;  %v153_v14 = vadd.f32 %v152_v8, %v148_v9  ;;  %v144_v15 = vmul.f32 %v3462_v10, %v3911_v20  ;;  %v319_v20 = vld [vmem:[#allocation8] sm:$0xff] }
 0x194   :  { %v145_v16 = vmul.f32 %v3464_v11, %v3904_v13  ;;  %v3121_v26 = vpack.c.bf16 %v320_v25, %v319_v20 }
 0x195   :  { %2575 = vmatmul.mubr.msk.f32.vlgmr.msra.gmra.mrb[0].mxu0 %vm93_vm0, %v153_v14  ;;  %v149_v17 = vmul.f32 %v147_v6, %v144_v15 }
 0x196   :  { %v3466_v18 = vpop.eup %3465  ;;  %268 = vmatprep.mubr.f32.mxu0 %v3762_v50  ;;  %v150_v22 = vmul.f32 %v147_v6, %v145_v16  ;;  %3122 = vmatprep.subr.bf16.mxu1 %v3121_v26 }
 0x197   :  { %v154_v19 = vadd.f32 %v152_v8, %v149_v17  ;;  %v146_v23 = vmul.f32 %v3466_v18, %v3914_v21  ;;  %3124 = vmatpush3.bf16.msra.mxu1 %v3121_v26  ;;  %v321_v21 = vld [vmem:[#allocation8 + $0x20] sm:$0xff] }
 0x198   :  { %v155_v12 = vadd.f32 %v152_v8, %v150_v22  ;;  %v3125_v28 = vpack.c.bf16 %v322_v27, %v321_v21 }
 0x199   :  { %2576 = vmatmul.mubr.msk.f32.gmra.mrb[2].mxu0 %vm93_vm0, %v154_v19  ;;  %v151_v24 = vmul.f32 %v147_v6, %v146_v23  ;;  %v3944_v19 = vsub.s32 0, %v3937_v48 }
 0x19a   :  { %274 = vmatprep.mubr.f32.mxu0 %v3762_v50  ;;  %3126 = vmatprep.subr.bf16.mxu1 %v3125_v28 }
 0x19b   :  { %v156_v13 = vadd.f32 %v152_v8, %v151_v24  ;;  %3128 = vmatpush3.bf16.msra.mxu1 %v3125_v28 }
 0x19c   :  { %3130 = vmatprep.subr.bf16.mxu1 %v3129_v31 }
 0x19d   :  { %2577 = vmatmul.mubr.msk.f32.gmra.mrb[4].mxu0 %vm93_vm0, %v155_v12  ;;  %v179_v12 = vrot.slane %v174_v51, %v3944_v19 }
 0x19e   :  { %280 = vmatprep.mubr.f32.mxu0 %v3762_v50 }
 0x19f   :  { %3132 = vmatpush3.bf16.msra.mxu1 %v3129_v31 }
 0x1a0   :  { %3134 = vmatprep.subr.bf16.mxu1 %v3133_v34 }
 0x1a1   :  { %2578 = vmatmul.mubr.msk.f32.gmra.mrb[6].mxu0 %vm93_vm0, %v156_v13 }
 0x1a2   :  { %596 = vmatprep.mubr.f32.mxu0 %v3762_v50 }
 0x1a3   :  { %3136 = vmatpush3.bf16.msra.mxu1 %v3133_v34 }
 0x1a4   :  { %3138 = vmatprep.subr.bf16.mxu1 %v3137_v37 }
 0x1a7   :  { %3140 = vmatpush3.bf16.msra.mxu1 %v3137_v37 }
 0x1a8   :  { %3142 = vmatprep.subr.bf16.mxu1 %v3141_v40 }
 0x1ab   :  { %3144 = vmatpush3.bf16.msra.mxu1 %v3141_v40 }
 0x1ac   :  { %3146 = vmatprep.subr.bf16.mxu1 %v3145_v43 }
 0x1af   :  { %3148 = vmatpush3.bf16.msra.mxu1 %v3145_v43 }
 0x1b0   :  { %3150 = vmatprep.subr.bf16.mxu1 %v3149_v46 }
 0x1b3   :  { %3152 = vmatpush3.bf16.msra.mxu1 %v3149_v46 }
 0x268   :  { %v264_v53 = vpop.f32.mrb[0].mxu0 }
 0x269   :  { %v266_v54 = vpop.f32.mrb[1].mxu0  ;;  %v265_v25 = vadd.f32 %v264_v53, %v179_v12 }
 0x26a   :  { %v267_v55 = vadd.f32 %v266_v54, %v183_v52 }
 0x26c   :  { %v287_v56 = vsub.f32 0.0, %v267_v55  ;;  %v270_v57 = vpop.f32.mrb[2].mxu0 }
 0x26d   :  { %v272_v58 = vpop.f32.mrb[3].mxu0  ;;  %v271_v28 = vadd.f32 %v270_v57, %v179_v12 }
 0x26e   :  { %v291_v59 = vmul.f32 1.442695, %v287_v56  ;;  %v273_v60 = vadd.f32 %v272_v58, %v183_v52 }
 0x270   :  { %3467 = vpow2.f32 %v291_v59  ;;  %v288_v61 = vsub.f32 0.0, %v273_v60  ;;  %v276_v62 = vpop.f32.mrb[4].mxu0 }
 0x271   :  { %v278_v63 = vpop.f32.mrb[5].mxu0  ;;  %v277_v32 = vadd.f32 %v276_v62, %v179_v12 }
 0x272   :  { %v293_v3 = vmul.f32 1.442695, %v288_v61  ;;  %v279_v4 = vadd.f32 %v278_v63, %v183_v52 }
 0x274   :  { %3469 = vpow2.f32 %v293_v3  ;;  %v289_v6 = vsub.f32 0.0, %v279_v4  ;;  %v282_v7 = vpop.f32.mrb[6].mxu0 }
 0x275   :  { %v284_v8 = vpop.f32.mrb[7].mxu0  ;;  %v283_v36 = vadd.f32 %v282_v7, %v179_v12  ;;  %v492_v12 = vld [vmem:[#allocation7 + $0x18] sm:$0xff] }
 0x276   :  { %v295_v9 = vmul.f32 1.442695, %v289_v6  ;;  %v285_v10 = vadd.f32 %v284_v8, %v183_v52 }
 0x278   :  { %3471 = vpow2.f32 %v295_v9  ;;  %v290_v11 = vsub.f32 0.0, %v285_v10 }
 0x27a   :  { %v3468_v14 = vpop.eup %3467  ;;  %v297_v15 = vmul.f32 1.442695, %v290_v11 }
 0x27b   :  { %v299_v16 = vadd.f32 1.0, %v3468_v14 }
 0x27c   :  { %3473 = vpow2.f32 %v297_v15 }
 0x27d   :  { %3475 = vrcp.f32 %v299_v16 }
 0x27e   :  { %v3470_v17 = vpop.eup %3469 }
 0x27f   :  { %v300_v18 = vadd.f32 1.0, %v3470_v17 }
 0x281   :  { %3477 = vrcp.f32 %v300_v18 }
 0x282   :  { %v3472_v22 = vpop.eup %3471 }
 0x283   :  { %v301_v23 = vadd.f32 1.0, %v3472_v22 }
 0x285   :  { %3479 = vrcp.f32 %v301_v23 }
 0x286   :  { %v3474_v24 = vpop.eup %3473 }
 0x287   :  { %v3476_v13 = vpop.eup %3475  ;;  %v302_v20 = vadd.f32 1.0, %v3474_v24  ;;  %v494_v24 = vld [vmem:[#allocation7 + $0x68] sm:$0xff] }
 0x288   :  { %v311_v26 = vmul.f32 %v3476_v13, %v267_v55  ;;  %v491_v13 = vld [vmem:[#allocation7 + $0x10] sm:$0xff] }
 0x289   :  { %3481 = vrcp.f32 %v302_v20  ;;  %v493_v20 = vld [vmem:[#allocation7 + $0x60] sm:$0xff] }
 0x28a   :  { %v315_v21 = vmul.f32 %v311_v26, %v265_v25  ;;  %v3153_v25 = vpack.c.bf16 %v494_v24, %v492_v12  ;;  %v3155_v26 = vpack.c.bf16 %v493_v20, %v491_v13  ;;  %v508_v12 = vld [vmem:[#allocation10 + $0x6] ss:$8 sm:$0x3] }
 0x28b   :  { %v3478_v27 = vpop.eup %3477  ;;  %v513_v24 = vrot.slane %v508_v12, %v3944_v19  ;;  %v517_v20 = vrot.slane %v508_v12, %v3940_v49 }
 0x28c   :  { %v312_v29 = vmul.f32 %v3478_v27, %v273_v60  ;;  %2843 = vmatprep.mubr.f32.mxu1 %v315_v21  ;;  %3154 = vmatprep.subr.bf16.mxu0 %v3153_v25  ;;  %v496_v21 = vld [vmem:[#allocation7 + $0xb8] sm:$0xff]  ;;  %v498_v27 = vld [vmem:[#allocation7 + $0x108] sm:$0xff] }
 0x28d   :  { %3156 = vmatpush1.bf16.msra.mxu0 %v3155_v26 }
 0x28e   :  { %v316_v30 = vmul.f32 %v312_v29, %v271_v28  ;;  %v3157_v28 = vpack.c.bf16 %v498_v27, %v496_v21  ;;  %v495_v29 = vld [vmem:[#allocation7 + $0xb0] sm:$0xff] }
 0x28f   :  { %v3480_v31 = vpop.eup %3479 }
 0x290   :  { %v313_v33 = vmul.f32 %v3480_v31, %v279_v4  ;;  %2844 = vmatmul.mubr.f32.vlgmr.msra.gmra.mrb[0].mxu1 %v316_v30  ;;  %v497_v30 = vld [vmem:[#allocation7 + $0x100] sm:$0xff]  ;;  %3158 = vmatprep.subr.bf16.mxu0 %v3157_v28 }
 0x291   :  { %v3159_v31 = vpack.c.bf16 %v497_v30, %v495_v29 }
 0x292   :  { %v317_v34 = vmul.f32 %v313_v33, %v277_v32  ;;  %v500_v32 = vld [vmem:[#allocation7 + $0x158] sm:$0xff]  ;;  %v502_v33 = vld [vmem:[#allocation7 + $0x1a8] sm:$0xff] }
 0x293   :  { %v3482_v35 = vpop.eup %3481  ;;  %3160 = vmatpush1.bf16.msra.mxu0 %v3159_v31 }
 0x294   :  { %v314_v37 = vmul.f32 %v3482_v35, %v285_v10  ;;  %2846 = vmatprep.mubr.f32.mxu1 %v317_v34  ;;  %v3161_v34 = vpack.c.bf16 %v502_v33, %v500_v32  ;;  %v499_v35 = vld [vmem:[#allocation7 + $0x150] sm:$0xff] }
 0x296   :  { %v318_v38 = vmul.f32 %v314_v37, %v283_v36  ;;  %v501_v36 = vld [vmem:[#allocation7 + $0x1a0] sm:$0xff]  ;;  %3162 = vmatprep.subr.bf16.mxu0 %v3161_v34 }
 0x297   :  { %v3163_v37 = vpack.c.bf16 %v501_v36, %v499_v35 }
 0x298   :  { %2847 = vmatmul.mubr.f32.gmra.mrb[2].mxu1 %v318_v38  ;;  %v504_v38 = vld [vmem:[#allocation7 + $0x1f8] sm:$0xff] }
 0x299   :  { %3164 = vmatpush1.bf16.msra.mxu0 %v3163_v37 }
 0x363   :  { %v2845_v40 = vpop.f32.mrb[0].mxu1 }
 0x364   :  { %v408_v41 = vadd.f32 %v2845_v40, %v335_v39  ;;  %v402_v42 = vpop.f32.mrb[1].mxu1 }
 0x365   :  { %v403_v43 = vadd.f32 %v402_v42, %v335_v39  ;;  %v505_v42 = vld [vmem:[#allocation7 + $0x240] sm:$0xff] }
 0x366   :  { %v422_v44 = vmul.f32 0.5, %v408_v41  ;;  %v503_v41 = vld [vmem:[#allocation7 + $0x1f0] sm:$0xff] }
 0x367   :  { %v421_v45 = vmul.f32 0.5, %v403_v43  ;;  %v3167_v43 = vpack.c.bf16 %v505_v42, %v503_v41 }
 0x368   :  { %v3948_v46 = vadd.f32 %v422_v44, %v3888_v2 }
 0x369   :  { %v3951_v47 = vadd.f32 %v421_v45, %v3884_v0 }
 0x36a   :  { %v432_v51 = vsel %vm93_vm0, %v3948_v46, 0.0 }
 0x36b   :  { %433 = vadd.xlane.f32.xlu1 %v432_v51  ;;  %v2848_v52 = vpop.f32.mrb[2].mxu1  ;;  %v429_v53 = vsel %vm93_vm0, %v3951_v47, 0.0 }
 0x36c   :  { %v418_v54 = vadd.f32 %v2848_v52, %v335_v39  ;;  %430 = vadd.xlane.f32.xlu0 %v429_v53  ;;  %v412_v55 = vpop.f32.mrb[3].mxu1 }
 0x36d   :  { %v413_v56 = vadd.f32 %v412_v55, %v335_v39  ;;  %v506_v39 = vld [vmem:[#allocation7 + $0x248] sm:$0xff] }
 0x36e   :  { %v424_v57 = vmul.f32 0.5, %v418_v54  ;;  %v3165_v40 = vpack.c.bf16 %v506_v39, %v504_v38 }
 0x36f   :  { %v423_v58 = vmul.f32 0.5, %v413_v56 }
 0x370   :  { %v3958_v2 = vadd.f32 %v424_v57, %v3894_v5  ;;  %3166 = vmatprep.subr.bf16.mxu0 %v3165_v40 }
 0x371   :  { %v3961_v0 = vadd.f32 %v423_v58, %v3886_v1  ;;  %3168 = vmatpush1.bf16.msra.mxu0 %v3167_v43 }
 0x372   :  { %v438_v59 = vsel %vm93_vm0, %v3958_v2, 0.0 }
 0x373   :  { %439 = vadd.xlane.f32.xlu1 %v438_v59  ;;  %v435_v60 = vsel %vm93_vm0, %v3961_v0, 0.0 }
 0x374   :  { %436 = vadd.xlane.f32.xlu0 %v435_v60 }
 0x3f8   :  { %v434_v61 = vpop.xlane.xlu1 %433 }
 0x3f9   :  { %v442_v62 = vmul.f32 0.015625, %v434_v61  ;;  %v431_v63 = vpop.xlane.xlu0 %430 }
 0x3fa   :  { %v441_v3 = vmul.f32 0.015625, %v431_v63  ;;  %v481_v63 = vld [vmem:[#allocation10 + $0x4] ss:$0 sm:$0xff] }
 0x3fb   :  { %v3968_v4 = vsub.f32 %v3948_v46, %v442_v62 }
 0x3fc   :  { %v3971_v5 = vsub.f32 %v3951_v47, %v441_v3 }
 0x3fd   :  { %v450_v1 = vmul.f32 %v3968_v4, %v3968_v4 }
 0x3fe   :  { %v449_v6 = vmul.f32 %v3971_v5, %v3971_v5 }
 0x3ff   :  { %v456_v7 = vsel %vm93_vm0, %v450_v1, 0.0 }
 0x400   :  { %457 = vadd.xlane.f32.xlu1 %v456_v7  ;;  %v440_v8 = vpop.xlane.xlu1 %439  ;;  %v453_v9 = vsel %vm93_vm0, %v449_v6, 0.0  ;;  %v486_v6 = vld [vmem:[#allocation10 + $0x5] ss:$0 sm:$0xff] }
 0x401   :  { %v444_v10 = vmul.f32 0.015625, %v440_v8  ;;  %454 = vadd.xlane.f32.xlu0 %v453_v9  ;;  %v437_v11 = vpop.xlane.xlu0 %436 }
 0x402   :  { %v443_v14 = vmul.f32 0.015625, %v437_v11 }
 0x403   :  { %v3980_v15 = vsub.f32 %v3958_v2, %v444_v10 }
 0x404   :  { %v3983_v16 = vsub.f32 %v3961_v0, %v443_v14 }
 0x405   :  { %v452_v17 = vmul.f32 %v3980_v15, %v3980_v15 }
 0x406   :  { %v451_v18 = vmul.f32 %v3983_v16, %v3983_v16 }
 0x407   :  { %v462_v22 = vsel %vm93_vm0, %v452_v17, 0.0 }
 0x408   :  { %463 = vadd.xlane.f32.xlu1 %v462_v22  ;;  %v459_v23 = vsel %vm93_vm0, %v451_v18, 0.0 }
 0x409   :  { %460 = vadd.xlane.f32.xlu0 %v459_v23 }
 0x48d   :  { %v458_v44 = vpop.xlane.xlu1 %457 }
 0x48e   :  { %v466_v45 = vmul.f32 0.015625, %v458_v44  ;;  %v455_v51 = vpop.xlane.xlu0 %454 }
 0x48f   :  { %v465_v52 = vmul.f32 0.015625, %v455_v51 }
 0x490   :  { %v470_v53 = vadd.f32 1e-05, %v466_v45 }
 0x491   :  { %v469_v54 = vadd.f32 1e-05, %v465_v52 }
 0x492   :  { %3483 = vrsqrt.f32 %v470_v53 }
 0x493   :  { %3485 = vrsqrt.f32 %v469_v54 }
 0x495   :  { %v464_v55 = vpop.xlane.xlu1 %463 }
 0x496   :  { %v468_v56 = vmul.f32 0.015625, %v464_v55  ;;  %v461_v57 = vpop.xlane.xlu0 %460 }
 0x497   :  { %v467_v58 = vmul.f32 0.015625, %v461_v57 }
 0x498   :  { %v472_v59 = vadd.f32 1e-05, %v468_v56 }
 0x499   :  { %v471_v60 = vadd.f32 1e-05, %v467_v58 }
 0x49a   :  { %3487 = vrsqrt.f32 %v472_v59 }
 0x49b   :  { %3489 = vrsqrt.f32 %v471_v60 }
 0x49c   :  { %v3484_v61 = vpop.eup %3483 }
 0x49d   :  { %v3486_v62 = vpop.eup %3485  ;;  %v478_v1 = vmul.f32 %v3484_v61, %v3968_v4 }
 0x49e   :  { %v477_v3 = vmul.f32 %v3486_v62, %v3971_v5 }
 0x49f   :  { %v483_v9 = vmul.f32 %v481_v63, %v478_v1  ;;  %v696_v1 = vld [vmem:[#allocation5 + $0x38] sm:$0xff] }
 0x4a0   :  { %v482_v7 = vmul.f32 %v481_v63, %v477_v3 }
 0x4a1   :  { %v488_v14 = vadd.f32 %v486_v6, %v483_v9 }
 0x4a2   :  { %v487_v8 = vadd.f32 %v486_v6, %v482_v7 }
 0x4a4   :  { %v3488_v10 = vpop.eup %3487  ;;  %2579 = vmatmul.mubr.msk.f32.vlgmr.msra.gmra.mrb[8].mxu0 %vm93_vm0, %v487_v8 }
 0x4a5   :  { %v3490_v11 = vpop.eup %3489  ;;  %602 = vmatprep.mubr.f32.mxu0 %v3762_v50  ;;  %v480_v18 = vmul.f32 %v3488_v10, %v3980_v15 }
 0x4a6   :  { %v479_v17 = vmul.f32 %v3490_v11, %v3983_v16 }
 0x4a7   :  { %v485_v22 = vmul.f32 %v481_v63, %v480_v18 }
 0x4a8   :  { %2580 = vmatmul.mubr.msk.f32.gmra.mrb[10].mxu0 %vm93_vm0, %v488_v14  ;;  %v484_v5 = vmul.f32 %v481_v63, %v479_v17 }
 0x4a9   :  { %608 = vmatprep.mubr.f32.mxu0 %v3762_v50  ;;  %v490_v23 = vadd.f32 %v486_v6, %v485_v22 }
 0x4aa   :  { %v489_v4 = vadd.f32 %v486_v6, %v484_v5 }
 0x4ac   :  { %2581 = vmatmul.mubr.msk.f32.gmra.mrb[12].mxu0 %vm93_vm0, %v489_v4 }
 0x4ad   :  { %614 = vmatprep.mubr.f32.mxu0 %v3762_v50 }
 0x4b0   :  { %2582 = vmatmul.mubr.msk.f32.gmra.mrb[14].mxu0 %vm93_vm0, %v490_v23 }
 0x577   :  { %v598_v16 = vpop.f32.mrb[8].mxu0 }
 0x578   :  { %v599_v15 = vadd.f32 %v598_v16, %v513_v24  ;;  %v600_v13 = vpop.f32.mrb[9].mxu0 }
 0x579   :  { %v601_v27 = vadd.f32 %v600_v13, %v517_v20 }
 0x57a   :  { %625 = vrot.lane.b32.xlu0 %v599_v15, %s3763_s4  ;;  %2881 = vmatprep.mubr.msk.f32.mxu0 %vm737_vm1, %v599_v15 }
 0x57b   :  { %v604_v25 = vpop.f32.mrb[10].mxu0 }
 0x57c   :  { %v4006_v26 = vadd.f32 %v604_v25, %v513_v24  ;;  %v606_v21 = vpop.f32.mrb[11].mxu0 }
 0x57d   :  { %v607_v28 = vadd.f32 %v606_v21, %v517_v20 }
 0x57e   :  { %627 = vrot.lane.b32.xlu1 %v4006_v26, %s3763_s4  ;;  %633 = vrot.lane.b32.xlu0 %v599_v15, %s3764_s1  ;;  %v3389_v41 = vpack.i.bf16 %v4006_v26, %v599_v15 }
 0x57f   :  { %v610_v29 = vpop.f32.mrb[12].mxu0  ;;  %v3217_v30 = vpack.c.bf16 %v607_v28, %v601_v27  ;;  %v4011_v31 = vpack.i.bf16 %v607_v28, %v601_v27 }
 0x580   :  { %v4013_v32 = vadd.f32 %v610_v29, %v513_v24  ;;  %v612_v33 = vpop.f32.mrb[13].mxu0 }
 0x581   :  { %3218 = vmatprep.subr.bf16.mxu1 %v3217_v30  ;;  %v613_v37 = vadd.f32 %v612_v33, %v517_v20 }
 0x582   :  { %3220 = vmatpush3.bf16.msra.mxu1 %v3217_v30  ;;  %637 = vrot.lane.b32.xlu0 %v4013_v32, %s3764_s1 }
 0x583   :  { %629 = vrot.lane.b32.xlu1 %v4013_v32, %s3763_s4  ;;  %v616_v34 = vpop.f32.mrb[14].mxu0 }
 0x584   :  { %v4019_v35 = vadd.f32 %v616_v34, %v513_v24  ;;  %v618_v36 = vpop.f32.mrb[15].mxu0 }
 0x585   :  { %v619_v38 = vadd.f32 %v618_v36, %v517_v20 }
 0x586   :  { %641 = vrot.lane.b32.xlu0 %v599_v15, %s3760_s19  ;;  %v3394_v42 = vpack.i.bf16 %v4019_v35, %v4013_v32 }
 0x587   :  { %631 = vrot.lane.b32.xlu1 %v4019_v35, %s3763_s4  ;;  %v3221_v39 = vpack.c.bf16 %v619_v38, %v613_v37  ;;  %v4024_v40 = vpack.i.bf16 %v619_v38, %v613_v37 }
 0x589   :  { %3222 = vmatprep.subr.bf16.mxu1 %v3221_v39 }
 0x58a   :  { %3224 = vmatpush3.bf16.msra.mxu1 %v3221_v39  ;;  %645 = vrot.lane.b32.xlu0 %v4013_v32, %s3760_s19 }
 0x58b   :  { %635 = vrot.lane.b32.xlu1 %v4006_v26, %s3764_s1 }
 0x58e   :  { %3390 = vrot.lane.b32.xlu0 %v3389_v41, %s3765_s17 }
 0x58f   :  { %639 = vrot.lane.b32.xlu1 %v4019_v35, %s3764_s1 }
 0x593   :  { %643 = vrot.lane.b32.xlu1 %v4006_v26, %s3760_s19 }
 0x597   :  { %647 = vrot.lane.b32.xlu1 %v4019_v35, %s3760_s19 }
 0x59b   :  { %3395 = vrot.lane.b32.xlu1 %v3394_v42, %s3765_s17 }
 0x5ec   :  { %v4041_v43 = vpop.permute.xlu0 %625 }
 0x5f0   :  { %v4043_v44 = vpop.permute.xlu1 %627  ;;  %v4045_v45 = vpop.permute.xlu0 %633 }
 0x5f1   :  { %v3399_v51 = vpack.i.bf16 %v4043_v44, %v4041_v43 }
 0x5f3   :  { %3400 = vrot.lane.b32.xlu0 %v3399_v51, %s3765_s17 }
 0x5f4   :  { %v4050_v52 = vpop.permute.xlu0 %637 }
 0x5f5   :  { %v4052_v53 = vpop.permute.xlu1 %629 }
 0x5f8   :  { %v4054_v54 = vpop.permute.xlu0 %641 }
 0x5f9   :  { %v4056_v55 = vpop.permute.xlu1 %631 }
 0x5fa   :  { %v3404_v56 = vpack.i.bf16 %v4056_v55, %v4052_v53 }
 0x5fc   :  { %3405 = vrot.lane.b32.xlu1 %v3404_v56, %s3765_s17  ;;  %v4061_v57 = vpop.permute.xlu0 %645 }
 0x5fd   :  { %v4063_v58 = vpop.permute.xlu1 %635 }
 0x5fe   :  { %v3409_v59 = vpack.i.bf16 %v4063_v58, %v4045_v45 }
 0x600   :  { %3410 = vrot.lane.b32.xlu0 %v3409_v59, %s3765_s17  ;;  %v3391_v60 = vpop.permute.xlu0 %3390 }
 0x601   :  { %v4068_v61 = vpop.permute.xlu1 %639  ;;  %v3393_v62 = vunpack.i.h.bf16 %v3391_v60  ;;  %v3392_v63 = vunpack.i.l.bf16 %v3391_v60 }
 0x602   :  { %v3414_v3 = vpack.i.bf16 %v4068_v61, %v4050_v52 }
 0x603   :  { %v3169_v6 = vpack.c.bf16 %v3393_v62, %v3392_v63 }
 0x604   :  { %3415 = vrot.lane.b32.xlu1 %v3414_v3, %s3765_s17 }
 0x605   :  { %v4079_v7 = vpop.permute.xlu1 %643  ;;  %3171 = vmatprep.subr.msk.bf16.mxu0 %vm4074_vm2, %v3169_v6 }
 0x606   :  { %v3419_v8 = vpack.i.bf16 %v4079_v7, %v4054_v54  ;;  %3174 = vmatpush3.bf16.xpose.msk.msra.mxu0 %vm4074_vm2, %v3169_v6  ;;  %v693_v6 = vld [vmem:[#allocation5 + $0x20] sm:$0xff] }
 0x608   :  { %3420 = vrot.lane.b32.xlu0 %v3419_v8, %s3765_s17 }
 0x609   :  { %v4088_v9 = vpop.permute.xlu1 %647 }
 0x60a   :  { %v3424_v10 = vpack.i.bf16 %v4088_v9, %v4061_v57 }
 0x60c   :  { %3430 = vrot.lane.b32.xlu0 %v4011_v31, %s3763_s4  ;;  %3425 = vrot.lane.b32.xlu1 %v3424_v10, %s3765_s17 }
 0x60d   :  { %v3396_v11 = vpop.permute.xlu1 %3395 }
 0x60e   :  { %v3398_v14 = vunpack.i.h.bf16 %v3396_v11  ;;  %v3397_v17 = vunpack.i.l.bf16 %v3396_v11  ;;  %v695_v11 = vld [vmem:[#allocation5 + $0x30] sm:$0xff] }
 0x610   :  { %v3175_v18 = vpack.c.bf16 %v3398_v14, %v3397_v17 }
 0x612   :  { %3177 = vmatprep.subr.msk.bf16.mxu0 %vm4074_vm2, %v3175_v18 }
 0x613   :  { %3180 = vmatpush3.bf16.xpose.msk.msra.mxu0 %vm4074_vm2, %v3175_v18 }
 0x665   :  { %v3401_v5 = vpop.permute.xlu0 %3400 }
 0x666   :  { %v3403_v4 = vunpack.i.h.bf16 %v3401_v5  ;;  %v3402_v22 = vunpack.i.l.bf16 %v3401_v5  ;;  %v697_v5 = vld [vmem:[#allocation5 + $0x40] sm:$0xff] }
 0x668   :  { %v3181_v23 = vpack.c.bf16 %v3403_v4, %v3402_v22 }
 0x66a   :  { %3183 = vmatprep.subr.msk.bf16.mxu0 %vm4074_vm2, %v3181_v23 }
 0x66b   :  { %3186 = vmatpush3.bf16.xpose.msk.msra.mxu0 %vm4074_vm2, %v3181_v23 }
 0x66e   :  { %v3406_v12 = vpop.permute.xlu1 %3405 }
 0x66f   :  { %v3408_v24 = vunpack.i.h.bf16 %v3406_v12  ;;  %v3407_v16 = vunpack.i.l.bf16 %v3406_v12  ;;  %v699_v12 = vld [vmem:[#allocation5 + $0x50] sm:$0xff] }
 0x671   :  { %v3187_v15 = vpack.c.bf16 %v3408_v24, %v3407_v16 }
 0x672   :  { %v3411_v13 = vpop.permute.xlu0 %3410 }
 0x673   :  { %v3413_v20 = vunpack.i.h.bf16 %v3411_v13  ;;  %v3412_v25 = vunpack.i.l.bf16 %v3411_v13  ;;  %3189 = vmatprep.subr.msk.bf16.mxu0 %vm4074_vm2, %v3187_v15  ;;  %v701_v13 = vld [vmem:[#allocation5 + $0x60] sm:$0xff] }
 0x674   :  { %3192 = vmatpush3.bf16.xpose.msk.msra.mxu0 %vm4074_vm2, %v3187_v15 }
 0x675   :  { %v3193_v21 = vpack.c.bf16 %v3413_v20, %v3412_v25 }
 0x676   :  { %v3416_v27 = vpop.permute.xlu1 %3415 }
 0x677   :  { %v3418_v28 = vunpack.i.h.bf16 %v3416_v27  ;;  %v3417_v29 = vunpack.i.l.bf16 %v3416_v27  ;;  %3195 = vmatprep.subr.msk.bf16.mxu0 %vm4074_vm2, %v3193_v21  ;;  %v703_v27 = vld [vmem:[#allocation5 + $0x70] sm:$0xff] }
 0x679   :  { %v3199_v33 = vpack.c.bf16 %v3418_v28, %v3417_v29  ;;  %v698_v29 = vld [vmem:[#allocation5 + $0x48] sm:$0xff] }
 0x67a   :  { %v3421_v30 = vpop.permute.xlu0 %3420 }
 0x67b   :  { %v3423_v36 = vunpack.i.h.bf16 %v3421_v30  ;;  %v3422_v37 = vunpack.i.l.bf16 %v3421_v30 }
 0x67c   :  { %3198 = vmatpush3.bf16.xpose.msk.msra.mxu0 %vm4074_vm2, %v3193_v21 }
 0x67d   :  { %3201 = vmatprep.subr.msk.bf16.mxu0 %vm4074_vm2, %v3199_v33  ;;  %v3205_v42 = vpack.c.bf16 %v3423_v36, %v3422_v37  ;;  %v702_v36 = vld [vmem:[#allocation5 + $0x68] sm:$0xff] }
 0x67e   :  { %v3431_v34 = vpop.permute.xlu0 %3430  ;;  %v3426_v51 = vpop.permute.xlu1 %3425 }
 0x67f   :  { %v3433_v38 = vunpack.i.h.bf16 %v3431_v34  ;;  %v3432_v39 = vunpack.i.l.bf16 %v3431_v34  ;;  %v3428_v56 = vunpack.i.h.bf16 %v3426_v51  ;;  %v3427_v59 = vunpack.i.l.bf16 %v3426_v51 }
 0x681   :  { %v3225_v41 = vpack.c.bf16 %v3433_v38, %v3432_v39  ;;  %v3211_v60 = vpack.c.bf16 %v3428_v56, %v3427_v59  ;;  %v704_v38 = vld [vmem:[#allocation5 + $0x78] sm:$0xff] }
 0x683   :  { %3226 = vmatprep.subr.bf16.mxu1 %v3225_v41 }
 0x684   :  { %3204 = vmatpush3.bf16.xpose.msk.msra.mxu0 %vm4074_vm2, %v3199_v33  ;;  %3228 = vmatpush3.bf16.msra.mxu1 %v3225_v41  ;;  %v700_v33 = vld [vmem:[#allocation5 + $0x58] sm:$0xff] }
 0x685   :  { %3207 = vmatprep.subr.msk.bf16.mxu0 %vm4074_vm2, %v3205_v42 }
 0x68c   :  { %3210 = vmatpush3.bf16.xpose.msk.msra.mxu0 %vm4074_vm2, %v3205_v42 }
 0x68d   :  { %3213 = vmatprep.subr.msk.bf16.mxu0 %vm4074_vm2, %v3211_v60 }
 0x694   :  { %3216 = vmatpush3.bf16.xpose.msk.msra.mxu0 %vm4074_vm2, %v3211_v60 }
 0x69b   :  { %2882 = vmatmul.mubr.msk.f32.vlgmr.msra.gmra.mrb[16].mxu0 %vm737_vm1, %v4006_v26  ;;  %v690_v26 = vld [vmem:[#allocation5 + $0x8] sm:$0xff] }
 0x69c   :  { %2884 = vmatprep.mubr.msk.f32.mxu0 %vm737_vm1, %v4013_v32  ;;  %v689_v32 = vld [vmem:[#allocation5] sm:$0xff] }
 0x69f   :  { %2885 = vmatmul.mubr.msk.f32.gmra.mrb[18].mxu0 %vm737_vm1, %v4019_v35 }
 0x6a0   :  { %2887 = vmatprep.mubr.msk.f32.mxu0 %vm737_vm1, %v4041_v43 }
 0x6a3   :  { %2888 = vmatmul.mubr.msk.f32.gmra.mrb[20].mxu0 %vm737_vm1, %v4043_v44 }
 0x6a4   :  { %2890 = vmatprep.mubr.msk.f32.mxu0 %vm737_vm1, %v4052_v53 }
 0x6a7   :  { %2891 = vmatmul.mubr.msk.f32.gmra.mrb[22].mxu0 %vm737_vm1, %v4056_v55 }
 0x6a8   :  { %2893 = vmatprep.mubr.msk.f32.mxu0 %vm737_vm1, %v4045_v45 }
 0x6ab   :  { %2894 = vmatmul.mubr.msk.f32.gmra.mrb[24].mxu0 %vm737_vm1, %v4063_v58  ;;  %v691_v58 = vld [vmem:[#allocation5 + $0x10] sm:$0xff] }
 0x6ac   :  { %2896 = vmatprep.mubr.msk.f32.mxu0 %vm737_vm1, %v4050_v52  ;;  %v692_v52 = vld [vmem:[#allocation5 + $0x18] sm:$0xff] }
 0x6af   :  { %2897 = vmatmul.mubr.msk.f32.gmra.mrb[26].mxu0 %vm737_vm1, %v4068_v61 }
 0x6b0   :  { %2899 = vmatprep.mubr.msk.f32.mxu0 %vm737_vm1, %v4054_v54 }
 0x6b3   :  { %2900 = vmatmul.mubr.msk.f32.gmra.mrb[28].mxu0 %vm737_vm1, %v4079_v7 }
 0x6b4   :  { %2902 = vmatprep.mubr.msk.f32.mxu0 %vm737_vm1, %v4061_v57  ;;  %v694_v57 = vld [vmem:[#allocation5 + $0x28] sm:$0xff] }
 0x6b7   :  { %2903 = vmatmul.mubr.msk.f32.gmra.mrb[30].mxu0 %vm737_vm1, %v4088_v9 }
 0x76e   :  { %v2883_v35 = vpop.f32.mrb[16].mxu0 }
 0x76f   :  { %v4153_v43 = vadd.f32 %v2883_v35, %v690_v26  ;;  %v868_v44 = vpop.f32.mrb[17].mxu0 }
 0x770   :  { %v4155_v45 = vadd.f32 %v868_v44, %v689_v32 }
 0x771   :  { %949 = vmax.xlane.f32.xlu1 %v4153_v43 }
 0x772   :  { %v2886_v53 = vpop.f32.mrb[18].mxu0  ;;  %947 = vmax.xlane.f32.xlu0 %v4155_v45 }
 0x773   :  { %v4159_v54 = vadd.f32 %v2886_v53, %v692_v52  ;;  %v878_v55 = vpop.f32.mrb[19].mxu0 }
 0x774   :  { %v4164_v3 = vadd.f32 %v878_v55, %v691_v58 }
 0x776   :  { %v2889_v61 = vpop.f32.mrb[20].mxu0  ;;  %953 = vmax.xlane.f32.xlu0 %v4159_v54 }
 0x777   :  { %v4162_v62 = vadd.f32 %v2889_v61, %v694_v57  ;;  %v888_v63 = vpop.f32.mrb[21].mxu0 }
 0x778   :  { %v4170_v10 = vadd.f32 %v888_v63, %v693_v6 }
 0x779   :  { %957 = vmax.xlane.f32.xlu1 %v4162_v62 }
 0x77a   :  { %v2892_v7 = vpop.f32.mrb[22].mxu0  ;;  %951 = vmax.xlane.f32.xlu0 %v4164_v3 }
 0x77b   :  { %v4168_v8 = vadd.f32 %v2892_v7, %v696_v1  ;;  %v898_v9 = vpop.f32.mrb[23].mxu0 }
 0x77c   :  { %v4174_v18 = vadd.f32 %v898_v9, %v695_v11 }
 0x77d   :  { %961 = vmax.xlane.f32.xlu1 %v4168_v8 }
 0x77e   :  { %v2895_v14 = vpop.f32.mrb[24].mxu0  ;;  %955 = vmax.xlane.f32.xlu0 %v4170_v10 }
 0x77f   :  { %v908_v17 = vpop.f32.mrb[25].mxu0  ;;  %v4193_v30 = vadd.f32 %v2895_v14, %v698_v29 }
 0x780   :  { %v4177_v23 = vadd.f32 %v908_v17, %v697_v5 }
 0x782   :  { %v2898_v4 = vpop.f32.mrb[26].mxu0  ;;  %959 = vmax.xlane.f32.xlu0 %v4174_v18 }
 0x783   :  { %v918_v22 = vpop.f32.mrb[27].mxu0  ;;  %v4196_v34 = vadd.f32 %v2898_v4, %v700_v33 }
 0x784   :  { %v4180_v15 = vadd.f32 %v918_v22, %v699_v12 }
 0x786   :  { %v2901_v24 = vpop.f32.mrb[28].mxu0  ;;  %963 = vmax.xlane.f32.xlu0 %v4177_v23 }
 0x787   :  { %v928_v16 = vpop.f32.mrb[29].mxu0  ;;  %v4199_v37 = vadd.f32 %v2901_v24, %v702_v36 }
 0x788   :  { %v4183_v21 = vadd.f32 %v928_v16, %v701_v13 }
 0x78a   :  { %v2904_v20 = vpop.f32.mrb[30].mxu0  ;;  %967 = vmax.xlane.f32.xlu0 %v4180_v15 }
 0x78b   :  { %v938_v25 = vpop.f32.mrb[31].mxu0  ;;  %v4202_v39 = vadd.f32 %v2904_v20, %v704_v38 }
 0x78c   :  { %v4188_v28 = vadd.f32 %v938_v25, %v703_v27 }
 0x78e   :  { %3435 = vrot.lane.b32.xlu1 %v4024_v40, %s3763_s4  ;;  %971 = vmax.xlane.f32.xlu0 %v4183_v21 }
 0x792   :  { %975 = vmax.xlane.f32.xlu0 %v4188_v28 }
 0x7a8   :  { %3440 = vrot.lane.b32.xlu0 %v4011_v31, %s3764_s1 }
 0x7b2   :  { %965 = vmax.xlane.f32.xlu1 %v4193_v30 }
 0x7b6   :  { %969 = vmax.xlane.f32.xlu1 %v4196_v34 }
 0x7ba   :  { %973 = vmax.xlane.f32.xlu1 %v4199_v37 }
 0x7be   :  { %977 = vmax.xlane.f32.xlu1 %v4202_v39 }
 0x7fe   :  { %v950_v41 = vpop.xlane.xlu1 %949 }
 0x7ff   :  { %v980_v42 = vsub.f32 %v4153_v43, %v950_v41  ;;  %v948_v51 = vpop.xlane.xlu0 %947 }
 0x800   :  { %v979_v56 = vsub.f32 %v4155_v45, %v948_v51 }
 0x801   :  { %v997_v59 = vmul.f32 1.442695, %v980_v42 }
 0x802   :  { %v995_v60 = vmul.f32 1.442695, %v979_v56 }
 0x803   :  { %3491 = vpow2.f32 %v997_v59  ;;  %v954_v26 = vpop.xlane.xlu0 %953 }
 0x804   :  { %3493 = vpow2.f32 %v995_v60  ;;  %v982_v32 = vsub.f32 %v4159_v54, %v954_v26 }
 0x806   :  { %v1001_v35 = vmul.f32 1.442695, %v982_v32  ;;  %v958_v44 = vpop.xlane.xlu1 %957 }
 0x807   :  { %v984_v52 = vsub.f32 %v4162_v62, %v958_v44  ;;  %v952_v53 = vpop.xlane.xlu0 %951 }
 0x808   :  { %3495 = vpow2.f32 %v1001_v35  ;;  %v981_v55 = vsub.f32 %v4164_v3, %v952_v53 }
 0x809   :  { %v1005_v58 = vmul.f32 1.442695, %v984_v52 }
 0x80a   :  { %v999_v57 = vmul.f32 1.442695, %v981_v55  ;;  %v962_v43 = vpop.xlane.xlu1 %961 }
 0x80b   :  { %v956_v61 = vpop.xlane.xlu0 %955  ;;  %v986_v45 = vsub.f32 %v4168_v8, %v962_v43 }
 0x80c   :  { %3497 = vpow2.f32 %v999_v57  ;;  %v983_v63 = vsub.f32 %v4170_v10, %v956_v61 }
 0x80d   :  { %v4212_v1 = vpop.eup %3491  ;;  %3499 = vpow2.f32 %v1005_v58  ;;  %v1009_v11 = vmul.f32 1.442695, %v986_v45 }
 0x80e   :  { %v4214_v54 = vpop.eup %3493  ;;  %v1003_v6 = vmul.f32 1.442695, %v983_v63  ;;  %v3436_v7 = vpop.permute.xlu1 %3435  ;;  %1029 = vadd.xlane.f32.xlu1 %v4212_v1 }
 0x80f   :  { %v3438_v62 = vunpack.i.h.bf16 %v3436_v7  ;;  %v3437_v3 = vunpack.i.l.bf16 %v3436_v7  ;;  %1027 = vadd.xlane.f32.xlu0 %v4214_v54  ;;  %v960_v9 = vpop.xlane.xlu0 %959 }
 0x810   :  { %3501 = vpow2.f32 %v1003_v6  ;;  %v985_v8 = vsub.f32 %v4174_v18, %v960_v9 }
 0x811   :  { %v3229_v14 = vpack.c.bf16 %v3438_v62, %v3437_v3  ;;  %3503 = vpow2.f32 %v1009_v11 }
 0x812   :  { %v4219_v10 = vpop.eup %3495  ;;  %v1007_v5 = vmul.f32 1.442695, %v985_v8 }
 0x813   :  { %3230 = vmatprep.subr.bf16.mxu1 %v3229_v14  ;;  %1033 = vadd.xlane.f32.xlu1 %v4219_v10  ;;  %v964_v17 = vpop.xlane.xlu0 %963 }
 0x814   :  { %3232 = vmatpush3.bf16.msra.mxu1 %v3229_v14  ;;  %3505 = vpow2.f32 %v1007_v5  ;;  %v987_v38 = vsub.f32 %v4177_v23, %v964_v17 }
 0x816   :  { %v4222_v4 = vpop.eup %3497  ;;  %v1011_v51 = vmul.f32 1.442695, %v987_v38 }
 0x817   :  { %1031 = vadd.xlane.f32.xlu1 %v4222_v4  ;;  %v968_v22 = vpop.xlane.xlu0 %967  ;;  %v4225_v12 = vpop.eup %3499 }
 0x818   :  { %v989_v60 = vsub.f32 %v4180_v15, %v968_v22  ;;  %3507 = vpow2.f32 %v1011_v51 }
 0x81a   :  { %v4227_v24 = vpop.eup %3501  ;;  %v1015_v44 = vmul.f32 1.442695, %v989_v60 }
 0x81b   :  { %1037 = vadd.xlane.f32.xlu1 %v4225_v12  ;;  %1035 = vadd.xlane.f32.xlu0 %v4227_v24  ;;  %v972_v18 = vpop.xlane.xlu0 %971  ;;  %v4231_v16 = vpop.eup %3503 }
 0x81e   :  { %v4234_v20 = vpop.eup %3505 }
 0x81f   :  { %1041 = vadd.xlane.f32.xlu1 %v4231_v16  ;;  %v976_v13 = vpop.xlane.xlu0 %975 }
 0x822   :  { %v4251_v53 = vpop.eup %3507 }
 0x823   :  { %1039 = vadd.xlane.f32.xlu1 %v4234_v20  ;;  %v3441_v25 = vpop.permute.xlu0 %3440 }
 0x824   :  { %v3443_v27 = vunpack.i.h.bf16 %v3441_v25  ;;  %v3442_v29 = vunpack.i.l.bf16 %v3441_v25 }
 0x826   :  { %v3233_v33 = vpack.c.bf16 %v3443_v27, %v3442_v29 }
 0x828   :  { %3234 = vmatprep.subr.bf16.mxu1 %v3233_v33 }
 0x829   :  { %3236 = vmatpush3.bf16.msra.mxu1 %v3233_v33 }
 0x831   :  { %3450 = vrot.lane.b32.xlu0 %v4011_v31, %s3760_s19 }
 0x834   :  { %3445 = vrot.lane.b32.xlu1 %v4024_v40, %s3764_s1 }
 0x835   :  { %3455 = vrot.lane.b32.xlu0 %v4024_v40, %s3760_s19  ;;  %v991_v40 = vsub.f32 %v4183_v21, %v972_v18 }
 0x837   :  { %v1019_v52 = vmul.f32 1.442695, %v991_v40 }
 0x83f   :  { %v966_v36 = vpop.xlane.xlu1 %965 }
 0x840   :  { %v988_v42 = vsub.f32 %v4193_v30, %v966_v36 }
 0x842   :  { %v1013_v26 = vmul.f32 1.442695, %v988_v42 }
 0x843   :  { %v970_v41 = vpop.xlane.xlu1 %969 }
 0x844   :  { %v990_v56 = vsub.f32 %v4196_v34, %v970_v41  ;;  %3509 = vpow2.f32 %v1013_v26  ;;  %v993_v34 = vsub.f32 %v4188_v28, %v976_v13 }
 0x846   :  { %v1017_v31 = vmul.f32 1.442695, %v990_v56 }
 0x847   :  { %v974_v59 = vpop.xlane.xlu1 %973 }
 0x848   :  { %v992_v32 = vsub.f32 %v4199_v37, %v974_v59  ;;  %3511 = vpow2.f32 %v1017_v31  ;;  %v1023_v37 = vmul.f32 1.442695, %v993_v34 }
 0x849   :  { %3513 = vpow2.f32 %v1015_v44 }
 0x84a   :  { %v1021_v23 = vmul.f32 1.442695, %v992_v32 }
 0x84b   :  { %v978_v35 = vpop.xlane.xlu1 %977 }
 0x84c   :  { %v994_v30 = vsub.f32 %v4202_v39, %v978_v35  ;;  %3515 = vpow2.f32 %v1021_v23 }
 0x84d   :  { %3517 = vpow2.f32 %v1019_v52 }
 0x84e   :  { %v1025_v15 = vmul.f32 1.442695, %v994_v30  ;;  %v4254_v55 = vpop.eup %3509 }
 0x850   :  { %3519 = vpow2.f32 %v1025_v15 }
 0x851   :  { %3521 = vpow2.f32 %v1023_v37 }
 0x852   :  { %v4256_v21 = vpop.eup %3511 }
 0x853   :  { %v4260_v39 = vpop.eup %3513 }
 0x854   :  { %1043 = vadd.xlane.f32.xlu0 %v4251_v53 }
 0x856   :  { %v4262_v28 = vpop.eup %3515 }
 0x857   :  { %v4266_v57 = vpop.eup %3517 }
 0x858   :  { %1045 = vadd.xlane.f32.xlu1 %v4254_v55  ;;  %1049 = vadd.xlane.f32.xlu0 %v4256_v21 }
 0x85a   :  { %v4268_v43 = vpop.eup %3519 }
 0x85b   :  { %v4272_v58 = vpop.eup %3521 }
 0x85c   :  { %1053 = vadd.xlane.f32.xlu1 %v4262_v28  ;;  %1047 = vadd.xlane.f32.xlu0 %v4260_v39 }
 0x860   :  { %1057 = vadd.xlane.f32.xlu1 %v4268_v43  ;;  %1051 = vadd.xlane.f32.xlu0 %v4266_v57 }
 0x864   :  { %1055 = vadd.xlane.f32.xlu0 %v4272_v58 }
 0x89b   :  { %v1030_v61 = vpop.xlane.xlu1 %1029 }
 0x89c   :  { %v1028_v45 = vpop.xlane.xlu0 %1027 }
 0x89d   :  { %3523 = vrcp.f32 %v1028_v45 }
 0x89e   :  { %3525 = vrcp.f32 %v1030_v61 }
 0x8a0   :  { %v1034_v63 = vpop.xlane.xlu1 %1033 }
 0x8a4   :  { %v1032_v6 = vpop.xlane.xlu1 %1031 }
 0x8a5   :  { %3527 = vrcp.f32 %v1032_v6 }
 0x8a6   :  { %3529 = vrcp.f32 %v1034_v63 }
 0x8a7   :  { %v3524_v7 = vpop.eup %3523 }
 0x8a8   :  { %v1038_v62 = vpop.xlane.xlu1 %1037  ;;  %v1075_v3 = vmul.f32 %v3524_v7, %v4214_v54  ;;  %v1036_v9 = vpop.xlane.xlu0 %1035 }
 0x8a9   :  { %3531 = vrcp.f32 %v1036_v9  ;;  %v3526_v38 = vpop.eup %3525 }
 0x8aa   :  { %2937 = vmatprep.mubr.f32.mxu1 %v1075_v3  ;;  %3533 = vrcp.f32 %v1038_v62  ;;  %v1076_v42 = vmul.f32 %v3526_v38, %v4212_v1  ;;  %v1538_v38 = vld [vmem:[#allocation7 + $0x250] sm:$0xff] }
 0x8ac   :  { %v1042_v11 = vpop.xlane.xlu1 %1041  ;;  %v3451_v8 = vpop.permute.xlu0 %3450 }
 0x8ad   :  { %v3453_v5 = vunpack.i.h.bf16 %v3451_v8  ;;  %v3452_v22 = vunpack.i.l.bf16 %v3451_v8 }
 0x8af   :  { %v3241_v29 = vpack.c.bf16 %v3453_v5, %v3452_v22  ;;  %v3528_v41 = vpop.eup %3527  ;;  %v1237_v5 = vld [vmem:[#allocation7 + $0x70] sm:$0xff] }
 0x8b0   :  { %v1040_v14 = vpop.xlane.xlu1 %1039  ;;  %v3456_v25 = vpop.permute.xlu0 %3455  ;;  %v1077_v56 = vmul.f32 %v3528_v41, %v4222_v4 }
 0x8b1   :  { %v3458_v33 = vunpack.i.h.bf16 %v3456_v25  ;;  %v3457_v36 = vunpack.i.l.bf16 %v3456_v25  ;;  %3535 = vrcp.f32 %v1040_v14  ;;  %v3530_v51 = vpop.eup %3529  ;;  %v1434_v25 = vld [vmem:[#allocation7 + $0x160] sm:$0xff] }
 0x8b2   :  { %3537 = vrcp.f32 %v1042_v11  ;;  %v1078_v60 = vmul.f32 %v3530_v51, %v4219_v10 }
 0x8b3   :  { %v3245_v54 = vpack.c.bf16 %v3458_v33, %v3457_v36  ;;  %v3532_v59 = vpop.eup %3531 }
 0x8b4   :  { %v3446_v17 = vpop.permute.xlu1 %3445  ;;  %v3534_v26 = vpop.eup %3533  ;;  %v1079_v31 = vmul.f32 %v3532_v59, %v4227_v24 }
 0x8b5   :  { %v3448_v18 = vunpack.i.h.bf16 %v3446_v17  ;;  %v3447_v13 = vunpack.i.l.bf16 %v3446_v17  ;;  %v1080_v35 = vmul.f32 %v3534_v26, %v4225_v12  ;;  %v1236_v17 = vld [vmem:[#allocation7 + $0x20] sm:$0xff] }
 0x8b7   :  { %v3237_v27 = vpack.c.bf16 %v3448_v18, %v3447_v13 }
 0x8b9   :  { %3238 = vmatprep.subr.bf16.mxu1 %v3237_v27 }
 0x8ba   :  { %3240 = vmatpush3.bf16.msra.mxu1 %v3237_v27  ;;  %v1435_v27 = vld [vmem:[#allocation7 + $0x1b0] sm:$0xff] }
 0x8bb   :  { %3242 = vmatprep.subr.bf16.mxu1 %v3241_v29  ;;  %v3536_v32 = vpop.eup %3535  ;;  %v3257_v33 = vpack.c.bf16 %v1435_v27, %v1434_v25  ;;  %v1715_v27 = vld [vmem:[#allocation7 + $0x168] sm:$0xff] }
 0x8bc   :  { %v3538_v44 = vpop.eup %3537  ;;  %v1081_v40 = vmul.f32 %v3536_v32, %v4234_v20 }
 0x8bd   :  { %v1082_v1 = vmul.f32 %v3538_v44, %v4231_v16  ;;  %v1644_v44 = vld [vmem:[#allocation10 + $0x7] ss:$0 sm:$0xff] }
 0x8be   :  { %3244 = vmatpush3.bf16.msra.mxu1 %v3241_v29 }
 0x8bf   :  { %3246 = vmatprep.subr.bf16.mxu1 %v3245_v54 }
 0x8c2   :  { %3248 = vmatpush3.bf16.msra.mxu1 %v3245_v54  ;;  %v1537_v54 = vld [vmem:[#allocation7 + $0x200] sm:$0xff] }
 0x8c3   :  { %v3261_v41 = vpack.c.bf16 %v1538_v38, %v1537_v54 }
 0x8c5   :  { %2938 = vmatmul.mubr.f32.vlgmr.msra.gmra.mrb[4].mxu1 %v1076_v42 }
 0x8c6   :  { %2940 = vmatprep.mubr.f32.mxu1 %v1077_v56 }
 0x8c9   :  { %2941 = vmatmul.mubr.f32.gmra.mrb[6].mxu1 %v1078_v60 }
 0x8ca   :  { %2943 = vmatprep.mubr.f32.mxu1 %v1079_v31 }
 0x8cd   :  { %2944 = vmatmul.mubr.f32.gmra.mrb[8].mxu1 %v1080_v35 }
 0x8ce   :  { %2946 = vmatprep.mubr.f32.mxu1 %v1081_v40 }
 0x8d1   :  { %2947 = vmatmul.mubr.f32.gmra.mrb[10].mxu1 %v1082_v1 }
 0x8e1   :  { %v1044_v4 = vpop.xlane.xlu0 %1043 }
 0x8e2   :  { %3539 = vrcp.f32 %v1044_v4 }
 0x8e5   :  { %v1046_v23 = vpop.xlane.xlu1 %1045  ;;  %v1050_v10 = vpop.xlane.xlu0 %1049 }
 0x8e6   :  { %3541 = vrcp.f32 %v1046_v23 }
 0x8e7   :  { %3543 = vrcp.f32 %v1050_v10 }
 0x8e9   :  { %v1054_v30 = vpop.xlane.xlu1 %1053  ;;  %v1048_v24 = vpop.xlane.xlu0 %1047 }
 0x8ea   :  { %3545 = vrcp.f32 %v1048_v24 }
 0x8eb   :  { %3547 = vrcp.f32 %v1054_v30 }
 0x8ec   :  { %v3540_v52 = vpop.eup %3539 }
 0x8ed   :  { %v1052_v34 = vpop.xlane.xlu0 %1051  ;;  %v1083_v12 = vmul.f32 %v3540_v52, %v4251_v53  ;;  %v1058_v20 = vpop.xlane.xlu1 %1057 }
 0x8ee   :  { %3549 = vrcp.f32 %v1052_v34 }
 0x8ef   :  { %2949 = vmatprep.mubr.f32.mxu1 %v1083_v12  ;;  %3551 = vrcp.f32 %v1058_v20 }
 0x8f0   :  { %v3542_v15 = vpop.eup %3541 }
 0x8f1   :  { %v1056_v16 = vpop.xlane.xlu0 %1055  ;;  %v1084_v37 = vmul.f32 %v3542_v15, %v4254_v55  ;;  %v3544_v61 = vpop.eup %3543 }
 0x8f2   :  { %3553 = vrcp.f32 %v1056_v16  ;;  %v1086_v6 = vmul.f32 %v3544_v61, %v4256_v21  ;;  %v1239_v21 = vld [vmem:[#allocation7 + $0x110] sm:$0xff]  ;;  %v1711_v16 = vld [vmem:[#allocation7 + $0x28] sm:$0xff] }
 0x8f3   :  { %2950 = vmatmul.mubr.f32.gmra.mrb[12].mxu1 %v1084_v37  ;;  %v1712_v37 = vld [vmem:[#allocation7 + $0x78] sm:$0xff] }
 0x8f4   :  { %v3546_v45 = vpop.eup %3545  ;;  %v3265_v61 = vpack.c.bf16 %v1712_v37, %v1711_v16 }
 0x8f5   :  { %v1085_v63 = vmul.f32 %v3546_v45, %v4260_v39  ;;  %v3548_v7 = vpop.eup %3547  ;;  %v1238_v39 = vld [vmem:[#allocation7 + $0xc0] sm:$0xff]  ;;  %v1714_v45 = vld [vmem:[#allocation7 + $0x118] sm:$0xff] }
 0x8f6   :  { %v1088_v9 = vmul.f32 %v3548_v7, %v4262_v28  ;;  %v3249_v14 = vpack.c.bf16 %v1239_v21, %v1238_v39  ;;  %3266 = vmatprep.subr.bf16.mxu0 %v3265_v61 }
 0x8f7   :  { %2952 = vmatprep.mubr.f32.mxu1 %v1085_v63  ;;  %3268 = vmatpush3.bf16.msra.mxu0 %v3265_v61 }
 0x8f8   :  { %v3550_v53 = vpop.eup %3549  ;;  %2953 = vmatmul.mubr.f32.gmra.mrb[14].mxu1 %v1086_v6  ;;  %3250 = vmatprep.subr.bf16.mxu1 %v3249_v14 }
 0x8f9   :  { %v1087_v62 = vmul.f32 %v3550_v53, %v4266_v57  ;;  %v3552_v3 = vpop.eup %3551  ;;  %3252 = vmatpush3.bf16.msra.mxu1 %v3249_v14  ;;  %v3253_v57 = vpack.c.bf16 %v1237_v5, %v1236_v17 }
 0x8fa   :  { %v1090_v8 = vmul.f32 %v3552_v3, %v4268_v43 }
 0x8fb   :  { %2955 = vmatprep.mubr.f32.mxu1 %v1087_v62  ;;  %3254 = vmatprep.subr.bf16.mxu1 %v3253_v57 }
 0x8fc   :  { %v3554_v11 = vpop.eup %3553  ;;  %2956 = vmatmul.mubr.f32.gmra.mrb[16].mxu1 %v1088_v9 }
 0x8fd   :  { %v1089_v55 = vmul.f32 %v3554_v11, %v4272_v58 }
 0x8ff   :  { %2958 = vmatprep.mubr.f32.mxu1 %v1089_v55 }
 0x900   :  { %2959 = vmatmul.mubr.f32.gmra.mrb[18].mxu1 %v1090_v8 }
 0x998   :  { %v2939_v22 = vpop.f32.mrb[4].mxu1 }
 0x999   :  { %v1157_v28 = vpop.f32.mrb[5].mxu1 }
 0x99c   :  { %v2942_v18 = vpop.f32.mrb[6].mxu1 }
 0x99d   :  { %v1167_v13 = vpop.f32.mrb[7].mxu1 }
 0x9a0   :  { %v2945_v58 = vpop.f32.mrb[8].mxu1 }
 0x9a1   :  { %v1177_v29 = vpop.f32.mrb[9].mxu1 }
 0x9a2   :  { %2965 = vmatprep.mubr.msk.f32.mxu1 %vm737_vm1, %v1177_v29 }
 0x9a3   :  { %2966 = vmatmul.mubr.msk.f32.vlgmr.msra.gmra.mrb[20].mxu1 %vm737_vm1, %v2945_v58  ;;  %v1716_v58 = vld [vmem:[#allocation7 + $0x1b8] sm:$0xff] }
 0x9a4   :  { %v2948_v43 = vpop.f32.mrb[10].mxu1  ;;  %3256 = vmatpush3.bf16.msra.mxu1 %v3253_v57  ;;  %v3273_v29 = vpack.c.bf16 %v1716_v58, %v1715_v27  ;;  %v1932_v27 = vld [vmem:[#allocation7 + $0x30] sm:$0xff]  ;;  %v1933_v58 = vld [vmem:[#allocation7 + $0x80] sm:$0xff] }
 0x9a5   :  { %v1187_v36 = vpop.f32.mrb[11].mxu1  ;;  %3258 = vmatprep.subr.bf16.mxu1 %v3257_v33 }
 0x9a6   :  { %2968 = vmatprep.mubr.msk.f32.mxu1 %vm737_vm1, %v1187_v36 }
 0x9a7   :  { %2969 = vmatmul.mubr.msk.f32.gmra.mrb[22].mxu1 %vm737_vm1, %v2948_v43  ;;  %v1718_v43 = vld [vmem:[#allocation7 + $0x258] sm:$0xff] }
 0x9a8   :  { %2975 = vmatprep.mubr.msk.f32.mxu1 %vm737_vm1, %v1157_v28 }
 0x9ab   :  { %2976 = vmatmul.mubr.msk.f32.vlgmr.msra.gmra.mrb[20].mxu1 %vm737_vm1, %v2939_v22 }
 0x9ac   :  { %2978 = vmatprep.mubr.msk.f32.mxu1 %vm737_vm1, %v1167_v13  ;;  %3260 = vmatpush3.bf16.msra.mxu1 %v3257_v33  ;;  %v1717_v33 = vld [vmem:[#allocation7 + $0x208] sm:$0xff] }
 0x9ad   :  { %3262 = vmatprep.subr.bf16.mxu1 %v3261_v41  ;;  %v3277_v36 = vpack.c.bf16 %v1718_v43, %v1717_v33  ;;  %v3281_v43 = vpack.c.bf16 %v1933_v58, %v1932_v27 }
 0x9af   :  { %2979 = vmatmul.mubr.msk.f32.gmra.mrb[22].mxu1 %vm737_vm1, %v2942_v18 }
 0x9c6   :  { %v2951_v42 = vpop.f32.mrb[12].mxu1 }
 0x9c7   :  { %v1197_v51 = vpop.f32.mrb[13].mxu1 }
 0x9c8   :  { %2985 = vmatprep.mubr.msk.f32.mxu1 %vm737_vm1, %v1197_v51 }
 0x9c9   :  { %2986 = vmatmul.mubr.msk.f32.vlgmr.msra.gmra.mrb[20].mxu1 %vm737_vm1, %v2951_v42 }
 0x9ca   :  { %3264 = vmatpush3.bf16.msra.mxu1 %v3261_v41 }
 0x9cb   :  { %v2954_v56 = vpop.f32.mrb[14].mxu1  ;;  %3282 = vmatprep.subr.bf16.mxu1 %v3281_v43 }
 0x9cc   :  { %v1207_v59 = vpop.f32.mrb[15].mxu1 }
 0x9cd   :  { %2988 = vmatprep.mubr.msk.f32.mxu1 %vm737_vm1, %v1207_v59 }
 0x9ce   :  { %2989 = vmatmul.mubr.msk.f32.gmra.mrb[22].mxu1 %vm737_vm1, %v2954_v56 }
 0x9cf   :  { %v2957_v60 = vpop.f32.mrb[16].mxu1 }
 0x9d0   :  { %v1217_v26 = vpop.f32.mrb[17].mxu1 }
 0x9d1   :  { %2995 = vmatprep.mubr.msk.f32.mxu1 %vm737_vm1, %v1217_v26 }
 0x9d2   :  { %2996 = vmatmul.mubr.msk.f32.vlgmr.msra.gmra.mrb[20].mxu1 %vm737_vm1, %v2957_v60 }
 0x9d3   :  { %v2960_v31 = vpop.f32.mrb[18].mxu1  ;;  %3284 = vmatpush3.bf16.msra.mxu1 %v3281_v43 }
 0x9d4   :  { %v1227_v32 = vpop.f32.mrb[19].mxu1 }
 0x9d5   :  { %2998 = vmatprep.mubr.msk.f32.mxu1 %vm737_vm1, %v1227_v32 }
 0x9d6   :  { %2999 = vmatmul.mubr.msk.f32.gmra.mrb[22].mxu1 %vm737_vm1, %v2960_v31 }
 0xaa5   :  { %v2997_v35 = vpop.f32.mrb[20].mxu1 }
 0xaa6   :  { %v1641_v40 = vadd.f32 %v2997_v35, %v3948_v46  ;;  %v1617_v1 = vpop.f32.mrb[21].mxu1 }
 0xaa7   :  { %v1640_v4 = vadd.f32 %v1617_v1, %v3951_v47 }
 0xaa8   :  { %v4309_v23 = vadd.f32 %v1644_v44, %v1641_v40  ;;  %v1701_v40 = vld [vmem:[#allocation10 + $0x10] ss:$0 sm:$0xff] }
 0xaa9   :  { %v4311_v10 = vadd.f32 %v1644_v44, %v1640_v4  ;;  %v3000_v30 = vpop.f32.mrb[22].mxu1 }
 0xaaa   :  { %v1643_v24 = vadd.f32 %v3000_v30, %v3958_v2  ;;  %v1627_v52 = vpop.f32.mrb[23].mxu1  ;;  %v1652_v34 = vsel %vm93_vm0, %v4309_v23, 0.0 }
 0xaab   :  { %v1642_v12 = vadd.f32 %v1627_v52, %v3961_v0  ;;  %1653 = vadd.xlane.f32.xlu1 %v1652_v34  ;;  %v1649_v46 = vsel %vm93_vm0, %v4311_v10, 0.0  ;;  %v1713_v0 = vld [vmem:[#allocation7 + $0xc8] sm:$0xff]  ;;  %v1706_v52 = vld [vmem:[#allocation10 + $0x11] ss:$0 sm:$0xff] }
 0xaac   :  { %v4319_v20 = vadd.f32 %v1644_v44, %v1643_v24  ;;  %1650 = vadd.xlane.f32.xlu0 %v1649_v46  ;;  %v3269_v63 = vpack.c.bf16 %v1714_v45, %v1713_v0 }
 0xaad   :  { %v4321_v47 = vadd.f32 %v1644_v44, %v1642_v12 }
 0xaae   :  { %v1658_v15 = vsel %vm93_vm0, %v4319_v20, 0.0  ;;  %3270 = vmatprep.subr.bf16.mxu0 %v3269_v63 }
 0xaaf   :  { %1659 = vadd.xlane.f32.xlu1 %v1658_v15  ;;  %v1655_v2 = vsel %vm93_vm0, %v4321_v47, 0.0  ;;  %3272 = vmatpush3.bf16.msra.mxu0 %v3269_v63 }
 0xab0   :  { %1656 = vadd.xlane.f32.xlu0 %v1655_v2  ;;  %3274 = vmatprep.subr.bf16.mxu0 %v3273_v29 }
 0xab3   :  { %3276 = vmatpush3.bf16.msra.mxu0 %v3273_v29 }
 0xab4   :  { %3278 = vmatprep.subr.bf16.mxu0 %v3277_v36 }
 0xab7   :  { %3280 = vmatpush3.bf16.msra.mxu0 %v3277_v36 }
 0xb38   :  { %v1654_v6 = vpop.xlane.xlu1 %1653 }
 0xb39   :  { %v1662_v7 = vmul.f32 0.015625, %v1654_v6  ;;  %v1651_v53 = vpop.xlane.xlu0 %1650  ;;  %v1719_v6 = vld [vmem:[#allocation10 + $0x12] ss:$0 sm:$0xff] }
 0xb3a   :  { %v1661_v62 = vmul.f32 0.015625, %v1651_v53 }
 0xb3b   :  { %v1666_v3 = vsub.f32 %v4309_v23, %v1662_v7 }
 0xb3c   :  { %v1665_v9 = vsub.f32 %v4311_v10, %v1661_v62  ;;  %v1660_v11 = vpop.xlane.xlu1 %1659 }
 0xb3d   :  { %v1664_v55 = vmul.f32 0.015625, %v1660_v11  ;;  %v1657_v8 = vpop.xlane.xlu0 %1656  ;;  %v1670_v39 = vmul.f32 %v1666_v3, %v1666_v3 }
 0xb3e   :  { %v1663_v21 = vmul.f32 0.015625, %v1657_v8  ;;  %v1669_v14 = vmul.f32 %v1665_v9, %v1665_v9 }
 0xb3f   :  { %v1668_v17 = vsub.f32 %v4319_v20, %v1664_v55  ;;  %v1676_v5 = vsel %vm93_vm0, %v1670_v39, 0.0 }
 0xb40   :  { %v1667_v57 = vsub.f32 %v4321_v47, %v1663_v21  ;;  %1677 = vadd.xlane.f32.xlu1 %v1676_v5  ;;  %v1673_v22 = vsel %vm93_vm0, %v1669_v14, 0.0 }
 0xb41   :  { %1674 = vadd.xlane.f32.xlu0 %v1673_v22  ;;  %v1672_v28 = vmul.f32 %v1668_v17, %v1668_v17 }
 0xb42   :  { %v1671_v18 = vmul.f32 %v1667_v57, %v1667_v57 }
 0xb43   :  { %v1682_v13 = vsel %vm93_vm0, %v1672_v28, 0.0 }
 0xb44   :  { %1683 = vadd.xlane.f32.xlu1 %v1682_v13  ;;  %v1679_v25 = vsel %vm93_vm0, %v1671_v18, 0.0 }
 0xb45   :  { %1680 = vadd.xlane.f32.xlu0 %v1679_v25 }
 0xbcd   :  { %v1678_v54 = vpop.xlane.xlu1 %1677 }
 0xbce   :  { %v1686_v38 = vmul.f32 0.015625, %v1678_v54  ;;  %v1675_v41 = vpop.xlane.xlu0 %1674  ;;  %v1934_v54 = vld [vmem:[#allocation7 + $0xd0] sm:$0xff] }
 0xbcf   :  { %v1685_v42 = vmul.f32 0.015625, %v1675_v41 }
 0xbd0   :  { %v1690_v51 = vadd.f32 1e-05, %v1686_v38  ;;  %v1935_v38 = vld [vmem:[#allocation7 + $0x120] sm:$0xff] }
 0xbd1   :  { %v1689_v56 = vadd.f32 1e-05, %v1685_v42  ;;  %v1684_v59 = vpop.xlane.xlu1 %1683  ;;  %v3285_v42 = vpack.c.bf16 %v1935_v38, %v1934_v54 }
 0xbd2   :  { %3555 = vrsqrt.f32 %v1690_v51  ;;  %v1688_v60 = vmul.f32 0.015625, %v1684_v59  ;;  %v1681_v26 = vpop.xlane.xlu0 %1680  ;;  %v1937_v59 = vld [vmem:[#allocation7 + $0x1c0] sm:$0xff] }
 0xbd3   :  { %3557 = vrsqrt.f32 %v1689_v56  ;;  %v1687_v31 = vmul.f32 0.015625, %v1681_v26  ;;  %3286 = vmatprep.subr.bf16.mxu1 %v3285_v42  ;;  %v1936_v56 = vld [vmem:[#allocation7 + $0x170] sm:$0xff] }
 0xbd4   :  { %v1692_v32 = vadd.f32 1e-05, %v1688_v60  ;;  %3288 = vmatpush3.bf16.msra.mxu1 %v3285_v42  ;;  %v3289_v60 = vpack.c.bf16 %v1937_v59, %v1936_v56 }
 0xbd5   :  { %v1691_v35 = vadd.f32 1e-05, %v1687_v31  ;;  %v1938_v31 = vld [vmem:[#allocation7 + $0x210] sm:$0xff] }
 0xbd6   :  { %3559 = vrsqrt.f32 %v1692_v32  ;;  %3290 = vmatprep.subr.bf16.mxu1 %v3289_v60  ;;  %v1939_v32 = vld [vmem:[#allocation7 + $0x260] sm:$0xff] }
 0xbd7   :  { %3561 = vrsqrt.f32 %v1691_v35 }
 0xbd8   :  { %3292 = vmatpush3.bf16.msra.mxu1 %v3289_v60 }
 0xbdc   :  { %v3556_v44 = vpop.eup %3555 }
 0xbdd   :  { %v3558_v1 = vpop.eup %3557  ;;  %v1698_v4 = vmul.f32 %v3556_v44, %v1666_v3  ;;  %v3293_v44 = vpack.c.bf16 %v1939_v32, %v1938_v31  ;;  %v1927_v31 = vld [vmem:[#allocation10 + $0x13] ss:$0 sm:$0xff] }
 0xbde   :  { %v1697_v30 = vmul.f32 %v3558_v1, %v1665_v9 }
 0xbdf   :  { %v1703_v24 = vmul.f32 %v1701_v40, %v1698_v4  ;;  %3294 = vmatprep.subr.bf16.mxu1 %v3293_v44  ;;  %v2042_v4 = vld [vmem:[#allocation7 + $0x38] sm:$0xff] }
 0xbe0   :  { %v3560_v34 = vpop.eup %3559  ;;  %v1702_v12 = vmul.f32 %v1701_v40, %v1697_v30  ;;  %3296 = vmatpush3.bf16.msra.mxu1 %v3293_v44  ;;  %v2043_v30 = vld [vmem:[#allocation7 + $0x88] sm:$0xff] }
 0xbe1   :  { %v3562_v46 = vpop.eup %3561  ;;  %v1700_v15 = vmul.f32 %v3560_v34, %v1668_v17  ;;  %v1708_v37 = vadd.f32 %v1706_v52, %v1703_v24  ;;  %v2044_v24 = vld [vmem:[#allocation7 + $0xd8] sm:$0xff]  ;;  %v2045_v34 = vld [vmem:[#allocation7 + $0x128] sm:$0xff] }
 0xbe2   :  { %v1707_v2 = vadd.f32 %v1706_v52, %v1702_v12  ;;  %v1699_v16 = vmul.f32 %v3562_v46, %v1667_v57  ;;  %v3301_v12 = vpack.c.bf16 %v2045_v34, %v2044_v24  ;;  %v2046_v46 = vld [vmem:[#allocation7 + $0x178] sm:$0xff] }
 0xbe3   :  { %v1705_v0 = vmul.f32 %v1701_v40, %v1700_v15  ;;  %v2047_v15 = vld [vmem:[#allocation7 + $0x1c8] sm:$0xff] }
 0xbe4   :  { %3017 = vmatprep.mubr.msk.f32.mxu0 %vm93_vm0, %v1707_v2  ;;  %v1704_v61 = vmul.f32 %v1701_v40, %v1699_v16  ;;  %v3305_v2 = vpack.c.bf16 %v2047_v15, %v2046_v46 }
 0xbe5   :  { %3018 = vmatmul.mubr.msk.f32.vlgmr.msra.gmra.mrb[32].mxu0 %vm93_vm0, %v1708_v37  ;;  %v1710_v63 = vadd.f32 %v1706_v52, %v1705_v0  ;;  %v1866_v37 = vand.u32 15, %v3937_v48 }
 0xbe6   :  { %v1709_v45 = vadd.f32 %v1706_v52, %v1704_v61  ;;  %v3297_v52 = vpack.c.bf16 %v2043_v30, %v2042_v4 }
 0xbe7   :  { %vm4359_vm4 = vcmp.ge.s32.totalorder %v1866_v37, 1  ;;  %vm4363_vm5 = vcmp.ge.s32.totalorder %v1866_v37, 2 }
 0xbe8   :  { %3020 = vmatprep.mubr.msk.f32.mxu0 %vm93_vm0, %v1709_v45  ;;  %3298 = vmatprep.subr.bf16.mxu0 %v3297_v52 }
 0xbe9   :  { %3021 = vmatmul.mubr.msk.f32.gmra.mrb[34].mxu0 %vm93_vm0, %v1710_v63 }
 0xbea   :  { %3300 = vmatpush3.bf16.msra.mxu0 %v3297_v52 }
 0xbeb   :  { %3302 = vmatprep.subr.bf16.mxu0 %v3301_v12 }
 0xbee   :  { %3304 = vmatpush3.bf16.msra.mxu0 %v3301_v12 }
 0xbef   :  { %3306 = vmatprep.subr.bf16.mxu0 %v3305_v2 }
 0xbf2   :  { %3308 = vmatpush3.bf16.msra.mxu0 %v3305_v2 }
 0xcb8   :  { %v3019_v7 = vpop.f32.mrb[32].mxu0 }
 0xcb9   :  { %v4339_v53 = vadd.f32 %v3019_v7, %v1719_v6  ;;  %v1798_v62 = vpop.f32.mrb[33].mxu0  ;;  %v1864_v7 = vadd.s32 16, %v3937_v48 }
 0xcba   :  { %v4341_v3 = vadd.f32 %v1798_v62, %v1719_v6 }
 0xcbb   :  { %v1818_v9 = vsub.f32 0.0, %v4339_v53 }
 0xcbc   :  { %v1817_v11 = vsub.f32 0.0, %v4341_v3  ;;  %v3022_v55 = vpop.f32.mrb[34].mxu0 }
 0xcbd   :  { %v4345_v8 = vadd.f32 %v3022_v55, %v1719_v6  ;;  %v1808_v39 = vpop.f32.mrb[35].mxu0  ;;  %v1823_v21 = vmul.f32 1.442695, %v1818_v9  ;;  %v1870_v55 = vld [vmem:[#allocation10 + $0x26] ss:$0 sm:$0xff] }
 0xcbe   :  { %v1821_v14 = vmul.f32 1.442695, %v1817_v11  ;;  %v4347_v17 = vadd.f32 %v1808_v39, %v1719_v6  ;;  %v1892_v39 = vld [vmem:[#allocation10 + $0x25] ss:$0 sm:$0xff]  ;;  %v2048_v6 = vld [vmem:[#allocation7 + $0x218] sm:$0xff] }
 0xcbf   :  { %v1820_v5 = vsub.f32 0.0, %v4345_v8 }
 0xcc0   :  { %3563 = vpow2.f32 %v1821_v14  ;;  %v1819_v57 = vsub.f32 0.0, %v4347_v17 }
 0xcc1   :  { %v1827_v22 = vmul.f32 1.442695, %v1820_v5  ;;  %3565 = vpow2.f32 %v1823_v21  ;;  %v1918_v5 = vld [vmem:[#allocation10 + $0x24] ss:$0 sm:$0xff] }
 0xcc2   :  { %v1825_v28 = vmul.f32 1.442695, %v1819_v57 }
 0xcc3   :  { %3567 = vpow2.f32 %v1827_v22 }
 0xcc4   :  { %3569 = vpow2.f32 %v1825_v28 }
 0xcca   :  { %v3564_v18 = vpop.eup %3563 }
 0xccb   :  { %v1829_v13 = vadd.f32 1.0, %v3564_v18  ;;  %v3566_v25 = vpop.eup %3565  ;;  %v1868_v18 = vand.u32 15, %v1864_v7  ;;  %v2049_v7 = vld [vmem:[#allocation7 + $0x268] sm:$0xff] }
 0xccc   :  { %v1830_v36 = vadd.f32 1.0, %v3566_v25 }
 0xccd   :  { %v3568_v29 = vpop.eup %3567  ;;  %3571 = vrcp.f32 %v1829_v13  ;;  %vm4383_vm7 = vcmp.ge.s32.totalorder %v1868_v18, 1  ;;  %vm4387_vm8 = vcmp.ge.s32.totalorder %v1868_v18, 2 }
 0xcce   :  { %v1832_v33 = vadd.f32 1.0, %v3568_v29  ;;  %v3570_v41 = vpop.eup %3569 }
 0xccf   :  { %v1831_v51 = vadd.f32 1.0, %v3570_v41 }
 0xcd0   :  { %3573 = vrcp.f32 %v1832_v33 }
 0xcd1   :  { %3575 = vrcp.f32 %v1830_v36 }
 0xcd2   :  { %3577 = vrcp.f32 %v1831_v51 }
 0xcd7   :  { %v3572_v26 = vpop.eup %3571 }
 0xcd8   :  { %1845 = vrot.lane.b32.xlu0 %v3572_v26, %s3765_s17 }
 0xcda   :  { %v3574_v35 = vpop.eup %3573 }
 0xcdb   :  { %1851 = vrot.lane.b32.xlu1 %v3574_v35, %s3765_s17  ;;  %v3576_v40 = vpop.eup %3575 }
 0xcdc   :  { %v3578_v1 = vpop.eup %3577 }
 0xcdf   :  { %1847 = vrot.lane.b32.xlu1 %v3576_v40, %s3765_s17 }
 0xce3   :  { %1849 = vrot.lane.b32.xlu1 %v3578_v1, %s3765_s17 }
 0xd4a   :  { %v1846_v16 = vpop.permute.xlu0 %1845 }
 0xd4b   :  { %v1857_v0 = vmul.f32 %v1846_v16, %v4341_v3 }
 0xd4d   :  { %v1852_v61 = vpop.permute.xlu1 %1851  ;;  %v1879_v62 = vrot.slane %v1857_v0, 7  ;;  %v1905_v9 = vrot.slane %v1857_v0, 6  ;;  %v1871_v13 = vmul.f32 %v1870_v55, %v1857_v0 }
 0xd4e   :  { %v1860_v45 = vmul.f32 %v1852_v61, %v4345_v8 }
 0xd50   :  { %v1882_v3 = vrot.slane %v1860_v45, 7  ;;  %v1908_v11 = vrot.slane %v1860_v45, 6  ;;  %v1874_v26 = vmul.f32 %v1870_v55, %v1860_v45 }
 0xd51   :  { %v1848_v21 = vpop.permute.xlu1 %1847 }
 0xd52   :  { %v1887_v8 = vsel %vm1883_vm3, %v1882_v3, %v1879_v62  ;;  %v1913_v14 = vsel %vm1909_vm6, %v1908_v11, %v1905_v9  ;;  %v1858_v57 = vmul.f32 %v1848_v21, %v4339_v53 }
 0xd53   :  { %v1888_v22 = vsel %vm4359_vm4, %v1887_v8, 0.0  ;;  %v1914_v28 = vsel %vm4363_vm5, %v1913_v14, 0.0 }
 0xd54   :  { %v1893_v25 = vmul.f32 %v1892_v39, %v1888_v22  ;;  %v1880_v27 = vrot.slane %v1858_v57, 7  ;;  %v1906_v58 = vrot.slane %v1858_v57, 6  ;;  %v1919_v33 = vmul.f32 %v1918_v5, %v1914_v28 }
 0xd55   :  { %v1850_v29 = vpop.permute.xlu1 %1849  ;;  %v1872_v38 = vmul.f32 %v1870_v55, %v1858_v57 }
 0xd56   :  { %v1886_v43 = vsel %vm1883_vm3, %v1879_v62, %v1880_v27  ;;  %v1912_v36 = vsel %vm1909_vm6, %v1905_v9, %v1906_v58  ;;  %v1859_v53 = vmul.f32 %v1850_v29, %v4347_v17  ;;  %v1897_v54 = vadd.f32 %v1893_v25, %v1871_v13  ;;  %v1940_v9 = vld [vmem:[#allocation10 + $0x14] ss:$0 sm:$0xff]  ;;  %v2151_v25 = vld [vmem:[#allocation10 + $0x15] ss:$0 sm:$0xff] }
 0xd57   :  { %v1894_v41 = vmul.f32 %v1892_v39, %v1886_v43  ;;  %v1920_v35 = vmul.f32 %v1918_v5, %v1912_v36  ;;  %v3309_v62 = vpack.c.bf16 %v2049_v7, %v2048_v6  ;;  %v2222_v7 = vld [vmem:[#allocation7 + $0xe0] sm:$0xff] }
 0xd58   :  { %v1881_v56 = vrot.slane %v1859_v53, 7  ;;  %v1907_v59 = vrot.slane %v1859_v53, 6  ;;  %v1923_v60 = vadd.f32 %v1919_v33, %v1897_v54  ;;  %v1873_v34 = vmul.f32 %v1870_v55, %v1859_v53 }
 0xd59   :  { %v1898_v32 = vadd.f32 %v1894_v41, %v1872_v38  ;;  %3310 = vmatprep.subr.bf16.mxu0 %v3309_v62 }
 0xd5a   :  { %v1884_v17 = vsel %vm1883_vm3, %v1881_v56, %v1882_v3  ;;  %v1885_v44 = vsel %vm1883_vm3, %v1880_v27, %v1881_v56  ;;  %v1910_v40 = vsel %vm1909_vm6, %v1907_v59, %v1908_v11  ;;  %v1911_v1 = vsel %vm1909_vm6, %v1906_v58, %v1907_v59  ;;  %3312 = vmatpush3.bf16.msra.mxu0 %v3309_v62  ;;  %v2224_v62 = vld [vmem:[#allocation7 + $0x130] sm:$0xff] }
 0xd5b   :  { %v1924_v4 = vadd.f32 %v1920_v35, %v1898_v32  ;;  %v1890_v30 = vsel %vm4383_vm7, %v1885_v44, 0.0  ;;  %v1896_v24 = vmul.f32 %v1892_v39, %v1884_v17  ;;  %v1916_v52 = vsel %vm4387_vm8, %v1911_v1, 0.0 }
 0xd5c   :  { %v1895_v12 = vmul.f32 %v1892_v39, %v1890_v30  ;;  %v1928_v46 = vadd.f32 %v1927_v31, %v1923_v60  ;;  %v1922_v2 = vmul.f32 %v1918_v5, %v1910_v40  ;;  %v1921_v0 = vmul.f32 %v1918_v5, %v1916_v52 }
 0xd5d   :  { %v1929_v15 = vadd.f32 %v1927_v31, %v1924_v4  ;;  %v1900_v16 = vadd.f32 %v1896_v24, %v1874_v26 }
 0xd5e   :  { %v1899_v37 = vadd.f32 %v1895_v12, %v1873_v34  ;;  %3039 = vmatprep.mubr.msk.f32.mxu1 %vm93_vm0, %v1928_v46 }
 0xd5f   :  { %3040 = vmatmul.mubr.msk.f32.vlgmr.msra.gmra.mrb[24].mxu1 %vm93_vm0, %v1929_v15  ;;  %v1926_v48 = vadd.f32 %v1922_v2, %v1900_v16  ;;  %v2219_v2 = vld [vmem:[#allocation7 + $0x48] sm:$0xff]  ;;  %v2221_v16 = vld [vmem:[#allocation7 + $0x98] sm:$0xff] }
 0xd60   :  { %v1925_v61 = vadd.f32 %v1921_v0, %v1899_v37  ;;  %v3313_v37 = vpack.c.bf16 %v2221_v16, %v2219_v2  ;;  %v2218_v0 = vld [vmem:[#allocation7 + $0x40] sm:$0xff]  ;;  %v2382_v16 = vld [vmem:[#allocation8 + $0x28] sm:$0xff] }
 0xd61   :  { %v1931_v63 = vadd.f32 %v1927_v31, %v1926_v48  ;;  %v2220_v48 = vld [vmem:[#allocation7 + $0x90] sm:$0xff] }
 0xd62   :  { %v1930_v45 = vadd.f32 %v1927_v31, %v1925_v61  ;;  %v3315_v61 = vpack.c.bf16 %v2220_v48, %v2218_v0  ;;  %3314 = vmatprep.subr.bf16.mxu1 %v3313_v37  ;;  %v2383_v37 = vld [vmem:[#allocation8 + $0x38] sm:$0xff] }
 0xd63   :  { %v3333_v0 = vpack.c.bf16 %v2383_v37, %v2382_v16  ;;  %v2385_v48 = vld [vmem:[#allocation8 + $0x58] sm:$0xff] }
 0xd64   :  { %3042 = vmatprep.mubr.msk.f32.mxu1 %vm93_vm0, %v1930_v45  ;;  %3316 = vmatpush1.bf16.msra.mxu1 %v3315_v61  ;;  %v2223_v45 = vld [vmem:[#allocation7 + $0xe8] sm:$0xff] }
 0xd65   :  { %3043 = vmatmul.mubr.msk.f32.gmra.mrb[26].mxu1 %vm93_vm0, %v1931_v63  ;;  %v2225_v63 = vld [vmem:[#allocation7 + $0x138] sm:$0xff] }
 0xd66   :  { %2323 = vmatprep.mubr.f32.mxu1 %v3762_v50  ;;  %v3317_v6 = vpack.c.bf16 %v2225_v63, %v2223_v45  ;;  %v2386_v45 = vld [vmem:[#allocation8 + $0x68] sm:$0xff] }
 0xd68   :  { %3318 = vmatprep.subr.bf16.mxu1 %v3317_v6  ;;  %v2388_v6 = vld [vmem:[#allocation8 + $0x88] sm:$0xff] }
 0xe32   :  { %v3041_v3 = vpop.f32.mrb[24].mxu1 }
 0xe33   :  { %v2025_v11 = vadd.f32 %v3041_v3, %v1940_v9  ;;  %v2019_v55 = vpop.f32.mrb[25].mxu1  ;;  %v2227_v3 = vld [vmem:[#allocation7 + $0x188] sm:$0xff] }
 0xe34   :  { %v2020_v39 = vadd.f32 %v2019_v55, %v1940_v9 }
 0xe35   :  { %v2039_v8 = vmax.f32 %v2025_v11, 0.0  ;;  %v2229_v11 = vld [vmem:[#allocation7 + $0x1d8] sm:$0xff] }
 0xe36   :  { %v2038_v21 = vmax.f32 %v2020_v39, 0.0  ;;  %v3321_v55 = vpack.c.bf16 %v2229_v11, %v2227_v3  ;;  %v2226_v39 = vld [vmem:[#allocation7 + $0x180] sm:$0xff]  ;;  %v2391_v3 = vld [vmem:[#allocation8 + $0xb8] sm:$0xff] }
 0xe38   :  { %v3044_v14 = vpop.f32.mrb[26].mxu1  ;;  %3061 = vmatprep.mubr.msk.f32.mxu0 %vm93_vm0, %v2038_v21  ;;  %v2228_v21 = vld [vmem:[#allocation7 + $0x1d0] sm:$0xff] }
 0xe39   :  { %v2035_v5 = vadd.f32 %v3044_v14, %v1940_v9  ;;  %v2029_v57 = vpop.f32.mrb[27].mxu1  ;;  %3062 = vmatmul.mubr.msk.f32.vlgmr.msra.gmra.mrb[36].mxu0 %vm93_vm0, %v2039_v8  ;;  %v3323_v8 = vpack.c.bf16 %v2228_v21, %v2226_v39  ;;  %v2231_v14 = vld [vmem:[#allocation7 + $0x228] sm:$0xff]  ;;  %v2393_v39 = vld [vmem:[#allocation8 + $0xd8] sm:$0xff] }
 0xe3a   :  { %v2030_v22 = vadd.f32 %v2029_v57, %v1940_v9  ;;  %v3319_v9 = vpack.c.bf16 %v2224_v62, %v2222_v7  ;;  %v2389_v7 = vld [vmem:[#allocation8 + $0x98] sm:$0xff] }
 0xe3b   :  { %v2041_v18 = vmax.f32 %v2035_v5, 0.0  ;;  %v2233_v5 = vld [vmem:[#allocation7 + $0x278] sm:$0xff]  ;;  %v3345_v62 = vpack.c.bf16 %v2389_v7, %v2388_v6 }
 0xe3c   :  { %v2040_v28 = vmax.f32 %v2030_v22, 0.0  ;;  %3320 = vmatpush1.bf16.msra.mxu1 %v3319_v9  ;;  %v3325_v57 = vpack.c.bf16 %v2233_v5, %v2231_v14  ;;  %v2230_v22 = vld [vmem:[#allocation7 + $0x220] sm:$0xff]  ;;  %v2390_v9 = vld [vmem:[#allocation8 + $0xa8] sm:$0xff]  ;;  %v2395_v14 = vld [vmem:[#allocation8 + $0xf8] sm:$0xff] }
 0xe3d   :  { %3322 = vmatprep.subr.bf16.mxu1 %v3321_v55  ;;  %v3349_v11 = vpack.c.bf16 %v2391_v3, %v2390_v9  ;;  %v2392_v55 = vld [vmem:[#allocation8 + $0xc8] sm:$0xff] }
 0xe3e   :  { %3064 = vmatprep.mubr.msk.f32.mxu0 %vm93_vm0, %v2040_v28  ;;  %v2232_v28 = vld [vmem:[#allocation7 + $0x270] sm:$0xff]  ;;  %v3353_v21 = vpack.c.bf16 %v2393_v39, %v2392_v55 }
 0xe3f   :  { %3065 = vmatmul.mubr.msk.f32.gmra.mrb[38].mxu0 %vm93_vm0, %v2041_v18  ;;  %v3327_v18 = vpack.c.bf16 %v2232_v28, %v2230_v22 }
 0xe40   :  { %3324 = vmatpush1.bf16.msra.mxu1 %v3323_v8  ;;  %v2394_v8 = vld [vmem:[#allocation8 + $0xe8] sm:$0xff] }
 0xe41   :  { %3326 = vmatprep.subr.bf16.mxu1 %v3325_v57  ;;  %v3357_v5 = vpack.c.bf16 %v2395_v14, %v2394_v8  ;;  %v2235_v57 = vld [vmem:[#allocation10 + $0x20] ss:$8 sm:$0x3] }
 0xe42   :  { %v2244_v22 = vrot.slane %v2235_v57, %v3940_v49 }
 0xe44   :  { %3328 = vmatpush1.bf16.msra.mxu1 %v3327_v18 }
 0xf0c   :  { %v3063_v13 = vpop.f32.mrb[36].mxu0 }
 0xf0d   :  { %v2148_v27 = vadd.f32 %v3063_v13, %v4309_v23  ;;  %v2128_v58 = vpop.f32.mrb[37].mxu0 }
 0xf0e   :  { %v2147_v29 = vadd.f32 %v2128_v58, %v4311_v10 }
 0xf0f   :  { %v4414_v33 = vadd.f32 %v2151_v25, %v2148_v27 }
 0xf10   :  { %v4416_v43 = vadd.f32 %v2151_v25, %v2147_v29 }
 0xf11   :  { %v2159_v36 = vsel %vm93_vm0, %v4414_v33, 0.0 }
 0xf12   :  { %2160 = vadd.xlane.f32.xlu1 %v2159_v36  ;;  %v3066_v53 = vpop.f32.mrb[38].mxu0  ;;  %v2156_v54 = vsel %vm93_vm0, %v4416_v43, 0.0 }
 0xf13   :  { %2157 = vadd.xlane.f32.xlu0 %v2156_v54  ;;  %v2138_v38 = vpop.f32.mrb[39].mxu0  ;;  %v2150_v41 = vadd.f32 %v3066_v53, %v4319_v20 }
 0xf14   :  { %v2149_v23 = vadd.f32 %v2138_v38, %v4321_v47 }
 0xf15   :  { %v4426_v10 = vadd.f32 %v2151_v25, %v2150_v41 }
 0xf16   :  { %v4424_v42 = vadd.f32 %v2151_v25, %v2149_v23 }
 0xf17   :  { %v2165_v56 = vsel %vm93_vm0, %v4426_v10, 0.0 }
 0xf18   :  { %v2162_v51 = vsel %vm93_vm0, %v4424_v42, 0.0 }
 0xf19   :  { %2163 = vadd.xlane.f32.xlu0 %v2162_v51 }
 0xf1d   :  { %2166 = vadd.xlane.f32.xlu0 %v2165_v56 }
 0xf9f   :  { %v2161_v59 = vpop.xlane.xlu1 %2160 }
 0xfa0   :  { %v2169_v60 = vmul.f32 0.015625, %v2161_v59  ;;  %v2158_v26 = vpop.xlane.xlu0 %2157 }
 0xfa1   :  { %v2168_v31 = vmul.f32 0.015625, %v2158_v26 }
 0xfa2   :  { %v4433_v20 = vsub.f32 %v4414_v33, %v2169_v60  ;;  %v2208_v60 = vld [vmem:[#allocation10 + $0x16] ss:$0 sm:$0xff] }
 0xfa3   :  { %v4436_v47 = vsub.f32 %v4416_v43, %v2168_v31 }
 0xfa4   :  { %v2177_v32 = vmul.f32 %v4433_v20, %v4433_v20 }
 0xfa5   :  { %v2176_v35 = vmul.f32 %v4436_v47, %v4436_v47 }
 0xfa6   :  { %v2164_v17 = vpop.xlane.xlu0 %2163  ;;  %v2183_v44 = vsel %vm93_vm0, %v2177_v32, 0.0  ;;  %v2213_v32 = vld [vmem:[#allocation10 + $0x17] ss:$0 sm:$0xff] }
 0xfa7   :  { %v2170_v40 = vmul.f32 0.015625, %v2164_v17  ;;  %2184 = vadd.xlane.f32.xlu1 %v2183_v44  ;;  %v2180_v1 = vsel %vm93_vm0, %v2176_v35, 0.0 }
 0xfa8   :  { %2181 = vadd.xlane.f32.xlu0 %v2180_v1 }
 0xfa9   :  { %v4445_v4 = vsub.f32 %v4424_v42, %v2170_v40 }
 0xfaa   :  { %v2167_v30 = vpop.xlane.xlu0 %2166 }
 0xfab   :  { %v2171_v24 = vmul.f32 0.015625, %v2167_v30  ;;  %v2178_v52 = vmul.f32 %v4445_v4, %v4445_v4 }
 0xfad   :  { %v4450_v34 = vsub.f32 %v4426_v10, %v2171_v24  ;;  %v2186_v12 = vsel %vm93_vm0, %v2178_v52, 0.0 }
 0xfae   :  { %2187 = vadd.xlane.f32.xlu0 %v2186_v12 }
 0xfaf   :  { %v2179_v46 = vmul.f32 %v4450_v34, %v4450_v34 }
 0xfb1   :  { %v2189_v15 = vsel %vm93_vm0, %v2179_v46, 0.0 }
 0xfb2   :  { %2190 = vadd.xlane.f32.xlu1 %v2189_v15  ;;  %v2381_v15 = vld [vmem:[#allocation8 + $0x18] sm:$0xff] }
0x1034   :  { %v2185_v13 = vpop.xlane.xlu1 %2184 }
0x1035   :  { %v2193_v25 = vmul.f32 0.015625, %v2185_v13  ;;  %v2182_v27 = vpop.xlane.xlu0 %2181 }
0x1036   :  { %v2192_v58 = vmul.f32 0.015625, %v2182_v27 }
0x1037   :  { %v2197_v29 = vadd.f32 1e-05, %v2193_v25 }
0x1038   :  { %v2196_v36 = vadd.f32 1e-05, %v2192_v58 }
0x1039   :  { %3579 = vrsqrt.f32 %v2197_v29 }
0x103a   :  { %3581 = vrsqrt.f32 %v2196_v36 }
0x103b   :  { %v2188_v53 = vpop.xlane.xlu0 %2187 }
0x103c   :  { %v2194_v54 = vmul.f32 0.015625, %v2188_v53 }
0x103e   :  { %v2198_v38 = vadd.f32 1e-05, %v2194_v54 }
0x103f   :  { %v2191_v41 = vpop.xlane.xlu1 %2190 }
0x1040   :  { %3583 = vrsqrt.f32 %v2198_v38  ;;  %v2195_v23 = vmul.f32 0.015625, %v2191_v41 }
0x1042   :  { %v2199_v51 = vadd.f32 1e-05, %v2195_v23 }
0x1043   :  { %v3580_v56 = vpop.eup %3579 }
0x1044   :  { %v3582_v59 = vpop.eup %3581  ;;  %3585 = vrsqrt.f32 %v2199_v51  ;;  %v2205_v31 = vmul.f32 %v3580_v56, %v4433_v20 }
0x1045   :  { %v2204_v26 = vmul.f32 %v3582_v59, %v4436_v47 }
0x1046   :  { %v2210_v44 = vmul.f32 %v2208_v60, %v2205_v31 }
0x1047   :  { %v2209_v35 = vmul.f32 %v2208_v60, %v2204_v26 }
0x1048   :  { %v2215_v30 = vadd.f32 %v2213_v32, %v2210_v44 }
0x1049   :  { %v2214_v17 = vadd.f32 %v2213_v32, %v2209_v35 }
0x104a   :  { %v3584_v40 = vpop.eup %3583 }
0x104b   :  { %2643 = vmatmul.mubr.msk.f32.vlgmr.msra.gmra.mrb[28].mxu1 %vm93_vm0, %v2214_v17  ;;  %v2206_v1 = vmul.f32 %v3584_v40, %v4445_v4  ;;  %v2380_v4 = vld [vmem:[#allocation8 + $0x8] sm:$0xff] }
0x104c   :  { %2329 = vmatprep.mubr.f32.mxu1 %v3762_v50  ;;  %v3329_v2 = vpack.c.bf16 %v2381_v15, %v2380_v4 }
0x104d   :  { %v2211_v24 = vmul.f32 %v2208_v60, %v2206_v1 }
0x104e   :  { %v3586_v52 = vpop.eup %3585  ;;  %3330 = vmatprep.subr.bf16.mxu0 %v3329_v2 }
0x104f   :  { %2644 = vmatmul.mubr.msk.f32.gmra.mrb[30].mxu1 %vm93_vm0, %v2215_v30  ;;  %v2207_v47 = vmul.f32 %v3586_v52, %v4450_v34  ;;  %v2216_v20 = vadd.f32 %v2213_v32, %v2211_v24  ;;  %3332 = vmatpush3.bf16.msra.mxu0 %v3329_v2  ;;  %v2384_v34 = vld [vmem:[#allocation8 + $0x48] sm:$0xff]  ;;  %v2240_v30 = vrot.slane %v2235_v57, %v3944_v19 }
0x1050   :  { %2335 = vmatprep.mubr.f32.mxu1 %v3762_v50  ;;  %3334 = vmatprep.subr.bf16.mxu0 %v3333_v0  ;;  %v3337_v61 = vpack.c.bf16 %v2385_v48, %v2384_v34 }
0x1051   :  { %v2212_v12 = vmul.f32 %v2208_v60, %v2207_v47 }
0x1053   :  { %2645 = vmatmul.mubr.msk.f32.gmra.mrb[32].mxu1 %vm93_vm0, %v2216_v20  ;;  %v2217_v46 = vadd.f32 %v2213_v32, %v2212_v12  ;;  %3336 = vmatpush3.bf16.msra.mxu0 %v3333_v0 }
0x1054   :  { %2341 = vmatprep.mubr.f32.mxu1 %v3762_v50  ;;  %3338 = vmatprep.subr.bf16.mxu0 %v3337_v61  ;;  %v2387_v50 = vld [vmem:[#allocation8 + $0x78] sm:$0xff] }
0x1055   :  { %v3341_v63 = vpack.c.bf16 %v2387_v50, %v2386_v45 }
0x1057   :  { %2646 = vmatmul.mubr.msk.f32.gmra.mrb[34].mxu1 %vm93_vm0, %v2217_v46  ;;  %3340 = vmatpush3.bf16.msra.mxu0 %v3337_v61 }
0x1058   :  { %3342 = vmatprep.subr.bf16.mxu0 %v3341_v63 }
0x105b   :  { %3344 = vmatpush3.bf16.msra.mxu0 %v3341_v63  ;;  %v2396_v63 = vld [vmem:[#allocation10 + $0x21] ss:$0 sm:$0xff] }
0x105c   :  { %3346 = vmatprep.subr.bf16.mxu0 %v3345_v62 }
0x105f   :  { %3348 = vmatpush3.bf16.msra.mxu0 %v3345_v62 }
0x1060   :  { %3350 = vmatprep.subr.bf16.mxu0 %v3349_v11 }
0x1063   :  { %3352 = vmatpush3.bf16.msra.mxu0 %v3349_v11 }
0x1064   :  { %3354 = vmatprep.subr.bf16.mxu0 %v3353_v21 }
0x1067   :  { %3356 = vmatpush3.bf16.msra.mxu0 %v3353_v21 }
0x1068   :  { %3358 = vmatprep.subr.bf16.mxu0 %v3357_v5 }
0x106b   :  { %3360 = vmatpush3.bf16.msra.mxu0 %v3357_v5 }
0x111e   :  { %v2325_v28 = vpop.f32.mrb[28].mxu1 }
0x111f   :  { %v2327_v18 = vpop.f32.mrb[29].mxu1  ;;  %v2326_v20 = vadd.f32 %v2325_v28, %v2240_v30 }
0x1120   :  { %v2328_v13 = vadd.f32 %v2327_v18, %v2244_v22 }
0x1122   :  { %v2348_v25 = vsub.f32 0.0, %v2328_v13  ;;  %v2331_v27 = vpop.f32.mrb[30].mxu1 }
0x1123   :  { %v2333_v58 = vpop.f32.mrb[31].mxu1  ;;  %v2332_v15 = vadd.f32 %v2331_v27, %v2240_v30 }
0x1124   :  { %v2352_v29 = vmul.f32 1.442695, %v2348_v25  ;;  %v2334_v36 = vadd.f32 %v2333_v58, %v2244_v22 }
0x1126   :  { %3587 = vpow2.f32 %v2352_v29  ;;  %v2349_v53 = vsub.f32 0.0, %v2334_v36  ;;  %v2337_v54 = vpop.f32.mrb[32].mxu1 }
0x1127   :  { %v2339_v38 = vpop.f32.mrb[33].mxu1  ;;  %v2338_v0 = vadd.f32 %v2337_v54, %v2240_v30 }
0x1128   :  { %v2354_v41 = vmul.f32 1.442695, %v2349_v53  ;;  %v2340_v23 = vadd.f32 %v2339_v38, %v2244_v22 }
0x112a   :  { %3589 = vpow2.f32 %v2354_v41  ;;  %v2350_v51 = vsub.f32 0.0, %v2340_v23  ;;  %v2343_v56 = vpop.f32.mrb[34].mxu1 }
0x112b   :  { %v2345_v59 = vpop.f32.mrb[35].mxu1  ;;  %v2344_v19 = vadd.f32 %v2343_v56, %v2240_v30 }
0x112c   :  { %v2356_v60 = vmul.f32 1.442695, %v2350_v51  ;;  %v2346_v49 = vadd.f32 %v2345_v59, %v2244_v22 }
0x112e   :  { %3591 = vpow2.f32 %v2356_v60  ;;  %v2351_v26 = vsub.f32 0.0, %v2346_v49 }
0x1130   :  { %v3588_v31 = vpop.eup %3587  ;;  %v2358_v32 = vmul.f32 1.442695, %v2351_v26 }
0x1131   :  { %v2360_v35 = vadd.f32 1.0, %v3588_v31 }
0x1132   :  { %3593 = vpow2.f32 %v2358_v32 }
0x1133   :  { %3595 = vrcp.f32 %v2360_v35 }
0x1134   :  { %v3590_v17 = vpop.eup %3589 }
0x1135   :  { %v2361_v44 = vadd.f32 1.0, %v3590_v17 }
0x1137   :  { %3597 = vrcp.f32 %v2361_v44 }
0x1138   :  { %v3592_v40 = vpop.eup %3591 }
0x1139   :  { %v2362_v1 = vadd.f32 1.0, %v3592_v40 }
0x113b   :  { %3599 = vrcp.f32 %v2362_v1 }
0x113c   :  { %v3594_v24 = vpop.eup %3593 }
0x113d   :  { %v3596_v52 = vpop.eup %3595  ;;  %v2363_v47 = vadd.f32 1.0, %v3594_v24 }
0x113e   :  { %v2372_v12 = vmul.f32 %v3596_v52, %v2328_v13 }
0x113f   :  { %3601 = vrcp.f32 %v2363_v47 }
0x1140   :  { %v2376_v46 = vmul.f32 %v2372_v12, %v2326_v20 }
0x1141   :  { %v3598_v4 = vpop.eup %3597 }
0x1142   :  { %v2373_v2 = vmul.f32 %v3598_v4, %v2334_v36  ;;  %3099 = vmatprep.mubr.f32.mxu0 %v2376_v46 }
0x1144   :  { %v2377_v16 = vmul.f32 %v2373_v2, %v2332_v15  ;;  %v2542_v2 = vld [vmem:[#allocation10 + $0x22] ss:$0 sm:$0xff] }
0x1145   :  { %v3600_v37 = vpop.eup %3599 }
0x1146   :  { %v2374_v34 = vmul.f32 %v3600_v37, %v2340_v23  ;;  %3100 = vmatmul.mubr.f32.vlgmr.msra.gmra.mrb[40].mxu0 %v2377_v16 }
0x1148   :  { %v2378_v48 = vmul.f32 %v2374_v34, %v2338_v0  ;;  %v2547_v34 = vld [vmem:[#allocation10 + $0x23] ss:$0 sm:$0xff] }
0x1149   :  { %v3602_v61 = vpop.eup %3601 }
0x114a   :  { %v2375_v45 = vmul.f32 %v3602_v61, %v2346_v49  ;;  %3102 = vmatprep.mubr.f32.mxu0 %v2378_v48 }
0x114c   :  { %v2379_v50 = vmul.f32 %v2375_v45, %v2344_v19 }
0x114e   :  { %3103 = vmatmul.mubr.f32.gmra.mrb[42].mxu0 %v2379_v50 }
0x1219   :  { %v3101_v6 = vpop.f32.mrb[40].mxu0 }
0x121a   :  { %v2469_v7 = vadd.f32 %v3101_v6, %v2396_v63  ;;  %v2463_v62 = vpop.f32.mrb[41].mxu0 }
0x121b   :  { %v2464_v9 = vadd.f32 %v2463_v62, %v2396_v63 }
0x121c   :  { %v2483_v3 = vmul.f32 0.5, %v2469_v7 }
0x121d   :  { %v2482_v11 = vmul.f32 0.5, %v2464_v9 }
0x121e   :  { %v2487_v55 = vadd.f32 %v2483_v3, %v4414_v33 }
0x121f   :  { %v2486_v39 = vadd.f32 %v2482_v11, %v4416_v43 }
0x1220   :  { %v2493_v21 = vsel %vm93_vm0, %v2487_v55, 0.0 }
0x1221   :  { %2494 = vadd.xlane.f32.xlu1 %v2493_v21  ;;  %v3104_v8 = vpop.f32.mrb[42].mxu0  ;;  %v2490_v14 = vsel %vm93_vm0, %v2486_v39, 0.0 }
0x1222   :  { %v2479_v5 = vadd.f32 %v3104_v8, %v2396_v63  ;;  %2491 = vadd.xlane.f32.xlu0 %v2490_v14  ;;  %v2473_v57 = vpop.f32.mrb[43].mxu0 }
0x1223   :  { %v2474_v22 = vadd.f32 %v2473_v57, %v2396_v63 }
0x1224   :  { %v2485_v28 = vmul.f32 0.5, %v2479_v5 }
0x1225   :  { %v2484_v18 = vmul.f32 0.5, %v2474_v22 }
0x1226   :  { %v2489_v13 = vadd.f32 %v2485_v28, %v4426_v10 }
0x1227   :  { %v2488_v25 = vadd.f32 %v2484_v18, %v4424_v42 }
0x1228   :  { %v2499_v33 = vsel %vm93_vm0, %v2489_v13, 0.0 }
0x1229   :  { %2500 = vadd.xlane.f32.xlu1 %v2499_v33  ;;  %v2496_v43 = vsel %vm93_vm0, %v2488_v25, 0.0 }
0x122a   :  { %2497 = vadd.xlane.f32.xlu0 %v2496_v43 }
0x12ae   :  { %v2495_v27 = vpop.xlane.xlu1 %2494 }
0x12af   :  { %v2503_v58 = vmul.f32 0.015625, %v2495_v27  ;;  %v2492_v29 = vpop.xlane.xlu0 %2491 }
0x12b0   :  { %v2502_v36 = vmul.f32 0.015625, %v2492_v29 }
0x12b1   :  { %v2507_v53 = vsub.f32 %v2487_v55, %v2503_v58 }
0x12b2   :  { %v2506_v54 = vsub.f32 %v2486_v39, %v2502_v36 }
0x12b3   :  { %v2511_v38 = vmul.f32 %v2507_v53, %v2507_v53 }
0x12b4   :  { %v2510_v41 = vmul.f32 %v2506_v54, %v2506_v54 }
0x12b5   :  { %v2517_v23 = vsel %vm93_vm0, %v2511_v38, 0.0 }
0x12b6   :  { %2518 = vadd.xlane.f32.xlu1 %v2517_v23  ;;  %v2501_v10 = vpop.xlane.xlu1 %2500  ;;  %v2514_v42 = vsel %vm93_vm0, %v2510_v41, 0.0 }
0x12b7   :  { %v2505_v51 = vmul.f32 0.015625, %v2501_v10  ;;  %2515 = vadd.xlane.f32.xlu0 %v2514_v42  ;;  %v2498_v56 = vpop.xlane.xlu0 %2497 }
0x12b8   :  { %v2504_v59 = vmul.f32 0.015625, %v2498_v56 }
0x12b9   :  { %v2509_v60 = vsub.f32 %v2489_v13, %v2505_v51 }
0x12ba   :  { %v2508_v49 = vsub.f32 %v2488_v25, %v2504_v59 }
0x12bb   :  { %v2513_v26 = vmul.f32 %v2509_v60, %v2509_v60 }
0x12bc   :  { %v2512_v31 = vmul.f32 %v2508_v49, %v2508_v49 }
0x12bd   :  { %v2523_v32 = vsel %vm93_vm0, %v2513_v26, 0.0 }
0x12be   :  { %2524 = vadd.xlane.f32.xlu1 %v2523_v32  ;;  %v2520_v35 = vsel %vm93_vm0, %v2512_v31, 0.0 }
0x12bf   :  { %2521 = vadd.xlane.f32.xlu0 %v2520_v35 }
0x1343   :  { %v2519_v17 = vpop.xlane.xlu1 %2518 }
0x1344   :  { %v2527_v44 = vmul.f32 0.015625, %v2519_v17  ;;  %v2516_v40 = vpop.xlane.xlu0 %2515 }
0x1345   :  { %v2526_v1 = vmul.f32 0.015625, %v2516_v40 }
0x1346   :  { %v2531_v30 = vadd.f32 1e-05, %v2527_v44 }
0x1347   :  { %v2530_v24 = vadd.f32 1e-05, %v2526_v1 }
0x1348   :  { %3603 = vrsqrt.f32 %v2531_v30 }
0x1349   :  { %3605 = vrsqrt.f32 %v2530_v24 }
0x134b   :  { %v2525_v52 = vpop.xlane.xlu1 %2524 }
0x134c   :  { %v2529_v47 = vmul.f32 0.015625, %v2525_v52  ;;  %v2522_v20 = vpop.xlane.xlu0 %2521 }
0x134d   :  { %v2528_v12 = vmul.f32 0.015625, %v2522_v20 }
0x134e   :  { %v2533_v46 = vadd.f32 1e-05, %v2529_v47 }
0x134f   :  { %v2532_v4 = vadd.f32 1e-05, %v2528_v12 }
0x1350   :  { %3607 = vrsqrt.f32 %v2533_v46 }
0x1351   :  { %3609 = vrsqrt.f32 %v2532_v4 }
0x1352   :  { %v3604_v15 = vpop.eup %3603 }
0x1353   :  { %v3606_v16 = vpop.eup %3605  ;;  %v2539_v37 = vmul.f32 %v3604_v15, %v2507_v53 }
0x1354   :  { %v2538_v0 = vmul.f32 %v3606_v16, %v2506_v54 }
0x1355   :  { %v2544_v48 = vmul.f32 %v2542_v2, %v2539_v37 }
0x1356   :  { %v2543_v61 = vmul.f32 %v2542_v2, %v2538_v0 }
0x1357   :  { %v2549_v19 = vadd.f32 %v2547_v34, %v2544_v48 }
0x1358   :  { %v2548_v45 = vadd.f32 %v2547_v34, %v2543_v61 }
0x1359   :  { %2553 = vst.msk [vmem:[#allocation11 + $0x8] sm:$0xff] %vm93_vm0, %v2549_v19 }
0x135a   :  { %v3608_v50 = vpop.eup %3607  ;;  %2552 = vst.msk [vmem:[#allocation11] sm:$0xff] %vm93_vm0, %v2548_v45 }
0x135b   :  { %v3610_v63 = vpop.eup %3609  ;;  %v2541_v6 = vmul.f32 %v3608_v50, %v2509_v60 }
0x135c   :  { %v2540_v7 = vmul.f32 %v3610_v63, %v2508_v49 }
0x135d   :  { %v2546_v62 = vmul.f32 %v2542_v2, %v2541_v6 }
0x135e   :  { %v2545_v9 = vmul.f32 %v2542_v2, %v2540_v7 }
0x135f   :  { %v2551_v3 = vadd.f32 %v2547_v34, %v2546_v62 }
0x1360   :  { %v2550_v11 = vadd.f32 %v2547_v34, %v2545_v9 }
0x1361   :  { %2555 = vst.msk [vmem:[#allocation11 + $0x18] sm:$0xff] %vm93_vm0, %v2551_v3 }
0x1362   :  { %2554 = vst.msk [vmem:[#allocation11 + $0x10] sm:$0xff] %vm93_vm0, %v2550_v11 }
0x1363   :  { %3732 = shalt.err (!%p3729_p2)
}
0x1364   :  { %s3733_s14 = scalar_lea.hbm %s4505_s5, 512 }
0x1365   :  { %p3734_p3 = scmp.ne.s32.totalorder %s4505_s5, %s3733_s14  ;;  %p3737_p4 = scmp.lt.u32.totalorder %s3733_s14, %s4505_s5 }
0x1367   :  { %p3739_p5 = pnand %p3737_p4, %p3734_p3 }
0x1369   :  { %3742 = shalt.err (!%p3739_p5)
}
0x136a   :  { %2567 = dma.vmem_to_hbm [thread:$0]  %s2562_s10, 512, %s4505_s5, [#allocation4], %s3753_s30, %s3753_s30, %s3754_s6  }
0x136b   :  { %3749 = dma.done.wait [#allocation4], 512  }
0x136c   :  { %3750 = vsyncadd [#allocation4], 4294966784 }
0x136d   :  { %2571 = vsyncpa [#allocation3], 1 }
0x136e   :  { %2572 = vsyncpa [#allocation6], 1 }
0x136f   :  { %2573 = vsyncpa [#allocation9], 1 }
0x1370   :  { %2574 = vsyncpa [#allocation4], 1 }

</bundles_post_ra>
